<compile_context>
chip_gen: v7x
topology: tpu7x:2x2x1
jax: 0.10.0
libtpu: 0.0.40
codegen_flags: <defaults>
</compile_context>

<pallas_src>
import functools

import jax
import jax.numpy as jnp
import numpy as np
from jax.experimental import pallas as pl
from jax.experimental.pallas import tpu as pltpu


def _pad_axis(x, axis, target):
    pad = target - x.shape[axis]
    if pad == 0:
        return x
    cfg = [(0, 0)] * x.ndim
    cfg[axis] = (0, pad)
    return jnp.pad(x, cfg)


def _round_up(n, m):
    return ((n + m - 1) // m) * m


def make_lstm_kernel(seq_len, tt, hp):
    """seq_len: true T (static); tt: timesteps per grid step; hp: padded H."""

    def kernel(xg_ref, whh_ref, wfc_ref, bfc_ref, out_ref, h_sc, c_sc):
        blk = pl.program_id(0)

        @pl.when(blk == 0)
        def _():
            h_sc[...] = jnp.zeros_like(h_sc)
            c_sc[...] = jnp.zeros_like(c_sc)

        whh = whh_ref[...]                   # (Hp, 4*Hp), grid-invariant
        t0 = blk * tt

        def step(i, carry):
            h, c = carry
            # Only the recurrent matmul lives on the serial path; the input
            # projection was precomputed (xg already includes b_ih + b_hh).
            gates = xg_ref[i] + jnp.dot(h, whh,
                                        preferred_element_type=jnp.float32)
            # Lane-aligned gate slices (each Hp = multiple of 128 lanes),
            # PyTorch gate order: i, f, g, o.
            i_g = jax.nn.sigmoid(gates[:, 0 * hp:1 * hp])
            f_g = jax.nn.sigmoid(gates[:, 1 * hp:2 * hp])
            g_g = jnp.tanh(gates[:, 2 * hp:3 * hp])
            o_g = jax.nn.sigmoid(gates[:, 3 * hp:4 * hp])
            c_new = f_g * c + i_g * g_g
            h_new = o_g * jnp.tanh(c_new)
            # Mask padded timesteps (and hook for lengths != None).
            valid = (t0 + i) < seq_len
            h_new = jnp.where(valid, h_new, h)
            c_new = jnp.where(valid, c_new, c)
            return h_new, c_new

        h_fin, c_fin = jax.lax.fori_loop(0, tt, step,
                                         (h_sc[...], c_sc[...]),
                                         unroll=True)
        h_sc[...] = h_fin
        c_sc[...] = c_fin

        # Final FC projection, only on the last grid step.  Correct only
        # because out_specs' index_map is constant (single writeback).
        @pl.when(blk == pl.num_programs(0) - 1)
        def _():
            out = (jnp.dot(h_fin, wfc_ref[...],
                           preferred_element_type=jnp.float32)
                   + bfc_ref[...])
            out_ref[...] = out.astype(out_ref.dtype)

    return kernel


def seq2seq_lstm_forward(tokens, params, *, tt=None):
    """tokens: (B, T) int32.  Returns (B, O) float32."""
    emb_table = params["embedding"]          # (V, H)
    w_ih_t = params["w_ih_t"]                # (H, 4H)
    w_hh_t = params["w_hh_t"]                # (H, 4H)
    bias = params["bias"]                    # (1, 4H)  == b_ih + b_hh
    w_fc_t = params["w_fc_t"]                # (H, O)
    b_fc = params["b_fc"]                    # (1, O)

    B, T = tokens.shape
    H = emb_table.shape[1]
    O = w_fc_t.shape[1]

    SUB, LANE = 8, 128
    Bp = _round_up(B, SUB)
    Hp = _round_up(H, LANE)
    Op = _round_up(O, LANE)

    TT = tt if tt is not None else min(T, 32)   # timesteps per grid step
    n_blk = -(-T // TT)
    Tp = n_blk * TT

    # ---- XLA glue: embedding gather + hoisted input projection -------------
    x_emb = jnp.take(emb_table, tokens, axis=0)             # (B, T, H)
    # One big MXU-friendly matmul; emitted directly as (T, B, 4H).
    xg = jnp.einsum('bth,hg->tbg', x_emb, w_ih_t) + bias    # (T, B, 4H)

    # ---- Pad to lane/sublane-aligned shapes (zero padding is neutral) ------
    xg = xg.reshape(T, B, 4, H)
    xg = _pad_axis(xg, 3, Hp)         # gate width H -> Hp (lane-aligned slabs)
    xg = _pad_axis(xg, 1, Bp)         # batch -> sublane multiple
    xg = _pad_axis(xg, 0, Tp)         # time -> multiple of TT
    xg = xg.reshape(Tp, Bp, 4 * Hp)

    whh = w_hh_t.reshape(H, 4, H)
    whh = _pad_axis(_pad_axis(whh, 2, Hp), 0, Hp).reshape(Hp, 4 * Hp)

    wfc = _pad_axis(_pad_axis(w_fc_t, 1, Op), 0, Hp)        # (Hp, Op)
    bfc = _pad_axis(b_fc, 1, Op)                            # (1, Op)

    kernel = make_lstm_kernel(T, TT, Hp)

    out = pl.pallas_call(
        kernel,
        out_shape=jax.ShapeDtypeStruct((Bp, Op), jnp.float32),
        grid_spec=pltpu.PrefetchScalarGridSpec(
            num_scalar_prefetch=0,
            grid=(n_blk,),
            in_specs=[
                # Precomputed gate pre-activations, streamed TT steps at a time.
                pl.BlockSpec((TT, Bp, 4 * Hp), lambda b: (b, 0, 0)),
                # Grid-invariant weights (resident across the whole grid).
                pl.BlockSpec((Hp, 4 * Hp), lambda b: (0, 0)),
                pl.BlockSpec((Hp, Op), lambda b: (0, 0)),
                pl.BlockSpec((1, Op), lambda b: (0, 0)),
            ],
            out_specs=pl.BlockSpec((Bp, Op), lambda b: (0, 0)),
            scratch_shapes=[
                pltpu.VMEM((Bp, Hp), jnp.float32),   # h state
                pltpu.VMEM((Bp, Hp), jnp.float32),   # c state
            ],
        ),
        compiler_params=pltpu.CompilerParams(
            dimension_semantics=("arbitrary",)),   # serial time recurrence
    )(xg, whh, wfc, bfc)

    return out[:B, :O]


def reference_forward(tokens, params):
    """Pure-JAX reference (mirrors PyTorch semantics, lengths=None)."""
    emb = jnp.take(params["embedding"], tokens, axis=0)   # (B, T, H)
    H = emb.shape[-1]
    w_ih_t, w_hh_t, bias = params["w_ih_t"], params["w_hh_t"], params["bias"]

    def step(carry, x_t):
        h, c = carry
        gates = x_t @ w_ih_t + h @ w_hh_t + bias[0]
        i = jax.nn.sigmoid(gates[:, 0 * H:1 * H])
        f = jax.nn.sigmoid(gates[:, 1 * H:2 * H])
        g = jnp.tanh(gates[:, 2 * H:3 * H])
        o = jax.nn.sigmoid(gates[:, 3 * H:4 * H])
        c = f * c + i * g
        h = o * jnp.tanh(c)
        return (h, c), h

    B = tokens.shape[0]
    h0 = jnp.zeros((B, H), jnp.float32)
    (h_last, _), _ = jax.lax.scan(step, (h0, h0), jnp.transpose(emb, (1, 0, 2)))
    return h_last @ params["w_fc_t"] + params["b_fc"][0]


def init_params(key, input_dim, hidden_dim, output_dim):
    ks = jax.random.split(key, 7)
    s = 1.0 / np.sqrt(hidden_dim)
    return {
        "embedding": jax.random.normal(ks[0], (input_dim, hidden_dim), jnp.float32),
        "w_ih_t": jax.random.uniform(ks[1], (hidden_dim, 4 * hidden_dim),
                                     jnp.float32, -s, s),
        "w_hh_t": jax.random.uniform(ks[2], (hidden_dim, 4 * hidden_dim),
                                     jnp.float32, -s, s),
        "bias": (jax.random.uniform(ks[3], (1, 4 * hidden_dim), jnp.float32, -s, s)
                 + jax.random.uniform(ks[4], (1, 4 * hidden_dim), jnp.float32, -s, s)),
        "w_fc_t": jax.random.uniform(ks[5], (hidden_dim, output_dim),
                                     jnp.float32, -s, s),
        "b_fc": jax.random.uniform(ks[6], (1, output_dim), jnp.float32, -s, s),
    }


if __name__ == "__main__":
    INPUT_DIM = 50    # vocab size
    HIDDEN_DIM = 32
    OUTPUT_DIM = 16
    B, T = 2, 8

    key = jax.random.PRNGKey(0)
    k_tok, k_par = jax.random.split(key)
    tokens = jax.random.randint(k_tok, (B, T), 0, INPUT_DIM, dtype=jnp.int32)
    params = init_params(k_par, INPUT_DIM, HIDDEN_DIM, OUTPUT_DIM)

    out = jax.block_until_ready(seq2seq_lstm_forward(tokens, params))
    ref = jax.block_until_ready(reference_forward(tokens, params))

    np.testing.assert_allclose(np.asarray(out), np.asarray(ref),
                               rtol=1e-5, atol=1e-5)
    assert out.shape == (B, OUTPUT_DIM)
    print("KERNEL_OK")
</pallas_src>

<mosaic_0001>
module attributes {stable_mosaic.version = 11 : i64} {
  func.func @kernel(%arg0: i32, %arg1: memref<8x8x512xf32, #tpu.memory_space<vmem>>, %arg2: memref<128x512xf32, #tpu.memory_space<vmem>>, %arg3: memref<128x128xf32, #tpu.memory_space<vmem>>, %arg4: memref<1x128xf32, #tpu.memory_space<vmem>>, %arg5: memref<8x128xf32, #tpu.memory_space<vmem>>, %arg6: memref<8x128xf32, #tpu.memory_space<vmem>>, %arg7: memref<8x128xf32, #tpu.memory_space<vmem>>) attributes {dimension_semantics = [#tpu.dimension_semantics<arbitrary>], iteration_bounds = array<i64: 1>, scalar_prefetch = 0 : i64, scratch_operands = 2 : i64, tpu.core_type = #tpu.core_type<tc>, window_params = [{transform_indices = @transform_0, window_bounds = array<i64: 8, 8, 512>}, {pipeline_mode = #tpu.pipeline_mode<synchronous>, transform_indices = @transform_1, window_bounds = array<i64: 128, 512>}, {pipeline_mode = #tpu.pipeline_mode<synchronous>, transform_indices = @transform_2, window_bounds = array<i64: 128, 128>}, {pipeline_mode = #tpu.pipeline_mode<synchronous>, transform_indices = @transform_3, window_bounds = array<i64: 1, 128>}, {pipeline_mode = #tpu.pipeline_mode<synchronous>, transform_indices = @transform_4, window_bounds = array<i64: 8, 128>}]} {
    %c0_i32 = arith.constant 0 : i32
    %0 = arith.cmpi eq, %arg0, %c0_i32 : i32
    %1 = arith.extui %0 : i1 to i32
    %c0_i32_0 = arith.constant 0 : i32
    %2 = arith.cmpi ne, %1, %c0_i32_0 : i32
    scf.if %2 {
      %cst_69 = arith.constant 0.000000e+00 : f32
      %284 = vector.broadcast %cst_69 : f32 to vector<8x128xf32>
      %c0_70 = arith.constant 0 : index
      %c0_71 = arith.constant 0 : index
      %285 = vector.load %arg6[%c0_70, %c0_71] : memref<8x128xf32, #tpu.memory_space<vmem>>, vector<8x128xf32>
      tpu.vector_store %arg6[%c0_70, %c0_71], %284 {strides = array<i32>} : memref<8x128xf32, #tpu.memory_space<vmem>>, vector<8x128xf32>,
      %cst_72 = arith.constant 0.000000e+00 : f32
      %286 = vector.broadcast %cst_72 : f32 to vector<8x128xf32>
      %c0_73 = arith.constant 0 : index
      %c0_74 = arith.constant 0 : index
      %287 = vector.load %arg7[%c0_73, %c0_74] : memref<8x128xf32, #tpu.memory_space<vmem>>, vector<8x128xf32>
      tpu.vector_store %arg7[%c0_73, %c0_74], %286 {strides = array<i32>} : memref<8x128xf32, #tpu.memory_space<vmem>>, vector<8x128xf32>,
    } else {
    }
    %c0 = arith.constant 0 : index
    %c0_1 = arith.constant 0 : index
    %3 = vector.load %arg2[%c0, %c0_1] : memref<128x512xf32, #tpu.memory_space<vmem>>, vector<128x512xf32>
    %c8_i32 = arith.constant 8 : i32
    %4 = arith.muli %arg0, %c8_i32 : i32
    %c0_2 = arith.constant 0 : index
    %c0_3 = arith.constant 0 : index
    %5 = vector.load %arg6[%c0_2, %c0_3] : memref<8x128xf32, #tpu.memory_space<vmem>>, vector<8x128xf32>
    %c0_4 = arith.constant 0 : index
    %c0_5 = arith.constant 0 : index
    %6 = vector.load %arg7[%c0_4, %c0_5] : memref<8x128xf32, #tpu.memory_space<vmem>>, vector<8x128xf32>
    %c0_i32_6 = arith.constant 0 : i32
    %7 = arith.index_cast %c0_i32_6 : i32 to index
    %c0_7 = arith.constant 0 : index
    %c0_8 = arith.constant 0 : index
    %8 = vector.load %arg1[%7, %c0_7, %c0_8] : memref<8x8x512xf32, #tpu.memory_space<vmem>>, vector<1x8x512xf32>
    %9 = vector.shape_cast %8 : vector<1x8x512xf32> to vector<8x512xf32>
    %cst = arith.constant dense<0.000000e+00> : vector<8x512xf32>
    %10 = tpu.matmul %5, %3, %cst {dimension_numbers = #tpu.dot_dimension_numbers<[1], [0], [0], [1], [0, 0, 1, 1], [], []>} : vector<8x128xf32>, vector<128x512xf32>, vector<8x512xf32> -> vector<8x512xf32>
    %11 = arith.addf %9, %10 : vector<8x512xf32>
    %12 = vector.extract_strided_slice %11 {offsets = [0, 0], sizes = [8, 128], strides = [1, 1]} : vector<8x512xf32> to vector<8x128xf32>
    %13 = arith.negf %12 : vector<8x128xf32>
    %14 = math.exp %13 : vector<8x128xf32>
    %cst_9 = arith.constant 1.000000e+00 : f32
    %15 = vector.broadcast %cst_9 : f32 to vector<8x128xf32>
    %16 = arith.addf %15, %14 : vector<8x128xf32>
    %17 = arith.divf %15, %16 : vector<8x128xf32>
    %18 = vector.extract_strided_slice %11 {offsets = [0, 128], sizes = [8, 128], strides = [1, 1]} : vector<8x512xf32> to vector<8x128xf32>
    %19 = arith.negf %18 : vector<8x128xf32>
    %20 = math.exp %19 : vector<8x128xf32>
    %cst_10 = arith.constant 1.000000e+00 : f32
    %21 = vector.broadcast %cst_10 : f32 to vector<8x128xf32>
    %22 = arith.addf %21, %20 : vector<8x128xf32>
    %23 = arith.divf %21, %22 : vector<8x128xf32>
    %24 = vector.extract_strided_slice %11 {offsets = [0, 256], sizes = [8, 128], strides = [1, 1]} : vector<8x512xf32> to vector<8x128xf32>
    %25 = math.tanh %24 : vector<8x128xf32>
    %26 = vector.extract_strided_slice %11 {offsets = [0, 384], sizes = [8, 128], strides = [1, 1]} : vector<8x512xf32> to vector<8x128xf32>
    %27 = arith.negf %26 : vector<8x128xf32>
    %28 = math.exp %27 : vector<8x128xf32>
    %cst_11 = arith.constant 1.000000e+00 : f32
    %29 = vector.broadcast %cst_11 : f32 to vector<8x128xf32>
    %30 = arith.addf %29, %28 : vector<8x128xf32>
    %31 = arith.divf %29, %30 : vector<8x128xf32>
    %32 = arith.mulf %23, %6 : vector<8x128xf32>
    %33 = arith.mulf %17, %25 : vector<8x128xf32>
    %34 = arith.addf %32, %33 : vector<8x128xf32>
    %35 = math.tanh %34 : vector<8x128xf32>
    %36 = arith.mulf %31, %35 : vector<8x128xf32>
    %37 = arith.addi %4, %c0_i32_6 : i32
    %c8_i32_12 = arith.constant 8 : i32
    %38 = arith.cmpi slt, %37, %c8_i32_12 : i32
    %39 = arith.select %38, %36, %5 : vector<8x128xf32>
    %40 = arith.select %38, %34, %6 : vector<8x128xf32>
    %c1_i32 = arith.constant 1 : i32
    %41 = arith.index_cast %c1_i32 : i32 to index
    %c0_13 = arith.constant 0 : index
    %c0_14 = arith.constant 0 : index
    %42 = vector.load %arg1[%41, %c0_13, %c0_14] : memref<8x8x512xf32, #tpu.memory_space<vmem>>, vector<1x8x512xf32>
    %43 = vector.shape_cast %42 : vector<1x8x512xf32> to vector<8x512xf32>
    %cst_15 = arith.constant dense<0.000000e+00> : vector<8x512xf32>
    %44 = tpu.matmul %39, %3, %cst_15 {dimension_numbers = #tpu.dot_dimension_numbers<[1], [0], [0], [1], [0, 0, 1, 1], [], []>} : vector<8x128xf32>, vector<128x512xf32>, vector<8x512xf32> -> vector<8x512xf32>
    %45 = arith.addf %43, %44 : vector<8x512xf32>
    %46 = vector.extract_strided_slice %45 {offsets = [0, 0], sizes = [8, 128], strides = [1, 1]} : vector<8x512xf32> to vector<8x128xf32>
    %47 = arith.negf %46 : vector<8x128xf32>
    %48 = math.exp %47 : vector<8x128xf32>
    %cst_16 = arith.constant 1.000000e+00 : f32
    %49 = vector.broadcast %cst_16 : f32 to vector<8x128xf32>
    %50 = arith.addf %49, %48 : vector<8x128xf32>
    %51 = arith.divf %49, %50 : vector<8x128xf32>
    %52 = vector.extract_strided_slice %45 {offsets = [0, 128], sizes = [8, 128], strides = [1, 1]} : vector<8x512xf32> to vector<8x128xf32>
    %53 = arith.negf %52 : vector<8x128xf32>
    %54 = math.exp %53 : vector<8x128xf32>
    %cst_17 = arith.constant 1.000000e+00 : f32
    %55 = vector.broadcast %cst_17 : f32 to vector<8x128xf32>
    %56 = arith.addf %55, %54 : vector<8x128xf32>
    %57 = arith.divf %55, %56 : vector<8x128xf32>
    %58 = vector.extract_strided_slice %45 {offsets = [0, 256], sizes = [8, 128], strides = [1, 1]} : vector<8x512xf32> to vector<8x128xf32>
    %59 = math.tanh %58 : vector<8x128xf32>
    %60 = vector.extract_strided_slice %45 {offsets = [0, 384], sizes = [8, 128], strides = [1, 1]} : vector<8x512xf32> to vector<8x128xf32>
    %61 = arith.negf %60 : vector<8x128xf32>
    %62 = math.exp %61 : vector<8x128xf32>
    %cst_18 = arith.constant 1.000000e+00 : f32
    %63 = vector.broadcast %cst_18 : f32 to vector<8x128xf32>
    %64 = arith.addf %63, %62 : vector<8x128xf32>
    %65 = arith.divf %63, %64 : vector<8x128xf32>
    %66 = arith.mulf %57, %40 : vector<8x128xf32>
    %67 = arith.mulf %51, %59 : vector<8x128xf32>
    %68 = arith.addf %66, %67 : vector<8x128xf32>
    %69 = math.tanh %68 : vector<8x128xf32>
    %70 = arith.mulf %65, %69 : vector<8x128xf32>
    %71 = arith.addi %4, %c1_i32 : i32
    %c8_i32_19 = arith.constant 8 : i32
    %72 = arith.cmpi slt, %71, %c8_i32_19 : i32
    %73 = arith.select %72, %70, %39 : vector<8x128xf32>
    %74 = arith.select %72, %68, %40 : vector<8x128xf32>
    %c2_i32 = arith.constant 2 : i32
    %75 = arith.index_cast %c2_i32 : i32 to index
    %c0_20 = arith.constant 0 : index
    %c0_21 = arith.constant 0 : index
    %76 = vector.load %arg1[%75, %c0_20, %c0_21] : memref<8x8x512xf32, #tpu.memory_space<vmem>>, vector<1x8x512xf32>
    %77 = vector.shape_cast %76 : vector<1x8x512xf32> to vector<8x512xf32>
    %cst_22 = arith.constant dense<0.000000e+00> : vector<8x512xf32>
    %78 = tpu.matmul %73, %3, %cst_22 {dimension_numbers = #tpu.dot_dimension_numbers<[1], [0], [0], [1], [0, 0, 1, 1], [], []>} : vector<8x128xf32>, vector<128x512xf32>, vector<8x512xf32> -> vector<8x512xf32>
    %79 = arith.addf %77, %78 : vector<8x512xf32>
    %80 = vector.extract_strided_slice %79 {offsets = [0, 0], sizes = [8, 128], strides = [1, 1]} : vector<8x512xf32> to vector<8x128xf32>
    %81 = arith.negf %80 : vector<8x128xf32>
    %82 = math.exp %81 : vector<8x128xf32>
    %cst_23 = arith.constant 1.000000e+00 : f32
    %83 = vector.broadcast %cst_23 : f32 to vector<8x128xf32>
    %84 = arith.addf %83, %82 : vector<8x128xf32>
    %85 = arith.divf %83, %84 : vector<8x128xf32>
    %86 = vector.extract_strided_slice %79 {offsets = [0, 128], sizes = [8, 128], strides = [1, 1]} : vector<8x512xf32> to vector<8x128xf32>
    %87 = arith.negf %86 : vector<8x128xf32>
    %88 = math.exp %87 : vector<8x128xf32>
    %cst_24 = arith.constant 1.000000e+00 : f32
    %89 = vector.broadcast %cst_24 : f32 to vector<8x128xf32>
    %90 = arith.addf %89, %88 : vector<8x128xf32>
    %91 = arith.divf %89, %90 : vector<8x128xf32>
    %92 = vector.extract_strided_slice %79 {offsets = [0, 256], sizes = [8, 128], strides = [1, 1]} : vector<8x512xf32> to vector<8x128xf32>
    %93 = math.tanh %92 : vector<8x128xf32>
    %94 = vector.extract_strided_slice %79 {offsets = [0, 384], sizes = [8, 128], strides = [1, 1]} : vector<8x512xf32> to vector<8x128xf32>
    %95 = arith.negf %94 : vector<8x128xf32>
    %96 = math.exp %95 : vector<8x128xf32>
    %cst_25 = arith.constant 1.000000e+00 : f32
    %97 = vector.broadcast %cst_25 : f32 to vector<8x128xf32>
    %98 = arith.addf %97, %96 : vector<8x128xf32>
    %99 = arith.divf %97, %98 : vector<8x128xf32>
    %100 = arith.mulf %91, %74 : vector<8x128xf32>
    %101 = arith.mulf %85, %93 : vector<8x128xf32>
    %102 = arith.addf %100, %101 : vector<8x128xf32>
    %103 = math.tanh %102 : vector<8x128xf32>
    %104 = arith.mulf %99, %103 : vector<8x128xf32>
    %105 = arith.addi %4, %c2_i32 : i32
    %c8_i32_26 = arith.constant 8 : i32
    %106 = arith.cmpi slt, %105, %c8_i32_26 : i32
    %107 = arith.select %106, %104, %73 : vector<8x128xf32>
    %108 = arith.select %106, %102, %74 : vector<8x128xf32>
    %c3_i32 = arith.constant 3 : i32
    %109 = arith.index_cast %c3_i32 : i32 to index
    %c0_27 = arith.constant 0 : index
    %c0_28 = arith.constant 0 : index
    %110 = vector.load %arg1[%109, %c0_27, %c0_28] : memref<8x8x512xf32, #tpu.memory_space<vmem>>, vector<1x8x512xf32>
    %111 = vector.shape_cast %110 : vector<1x8x512xf32> to vector<8x512xf32>
    %cst_29 = arith.constant dense<0.000000e+00> : vector<8x512xf32>
    %112 = tpu.matmul %107, %3, %cst_29 {dimension_numbers = #tpu.dot_dimension_numbers<[1], [0], [0], [1], [0, 0, 1, 1], [], []>} : vector<8x128xf32>, vector<128x512xf32>, vector<8x512xf32> -> vector<8x512xf32>
    %113 = arith.addf %111, %112 : vector<8x512xf32>
    %114 = vector.extract_strided_slice %113 {offsets = [0, 0], sizes = [8, 128], strides = [1, 1]} : vector<8x512xf32> to vector<8x128xf32>
    %115 = arith.negf %114 : vector<8x128xf32>
    %116 = math.exp %115 : vector<8x128xf32>
    %cst_30 = arith.constant 1.000000e+00 : f32
    %117 = vector.broadcast %cst_30 : f32 to vector<8x128xf32>
    %118 = arith.addf %117, %116 : vector<8x128xf32>
    %119 = arith.divf %117, %118 : vector<8x128xf32>
    %120 = vector.extract_strided_slice %113 {offsets = [0, 128], sizes = [8, 128], strides = [1, 1]} : vector<8x512xf32> to vector<8x128xf32>
    %121 = arith.negf %120 : vector<8x128xf32>
    %122 = math.exp %121 : vector<8x128xf32>
    %cst_31 = arith.constant 1.000000e+00 : f32
    %123 = vector.broadcast %cst_31 : f32 to vector<8x128xf32>
    %124 = arith.addf %123, %122 : vector<8x128xf32>
    %125 = arith.divf %123, %124 : vector<8x128xf32>
    %126 = vector.extract_strided_slice %113 {offsets = [0, 256], sizes = [8, 128], strides = [1, 1]} : vector<8x512xf32> to vector<8x128xf32>
    %127 = math.tanh %126 : vector<8x128xf32>
    %128 = vector.extract_strided_slice %113 {offsets = [0, 384], sizes = [8, 128], strides = [1, 1]} : vector<8x512xf32> to vector<8x128xf32>
    %129 = arith.negf %128 : vector<8x128xf32>
    %130 = math.exp %129 : vector<8x128xf32>
    %cst_32 = arith.constant 1.000000e+00 : f32
    %131 = vector.broadcast %cst_32 : f32 to vector<8x128xf32>
    %132 = arith.addf %131, %130 : vector<8x128xf32>
    %133 = arith.divf %131, %132 : vector<8x128xf32>
    %134 = arith.mulf %125, %108 : vector<8x128xf32>
    %135 = arith.mulf %119, %127 : vector<8x128xf32>
    %136 = arith.addf %134, %135 : vector<8x128xf32>
    %137 = math.tanh %136 : vector<8x128xf32>
    %138 = arith.mulf %133, %137 : vector<8x128xf32>
    %139 = arith.addi %4, %c3_i32 : i32
    %c8_i32_33 = arith.constant 8 : i32
    %140 = arith.cmpi slt, %139, %c8_i32_33 : i32
    %141 = arith.select %140, %138, %107 : vector<8x128xf32>
    %142 = arith.select %140, %136, %108 : vector<8x128xf32>
    %c4_i32 = arith.constant 4 : i32
    %143 = arith.index_cast %c4_i32 : i32 to index
    %c0_34 = arith.constant 0 : index
    %c0_35 = arith.constant 0 : index
    %144 = vector.load %arg1[%143, %c0_34, %c0_35] : memref<8x8x512xf32, #tpu.memory_space<vmem>>, vector<1x8x512xf32>
    %145 = vector.shape_cast %144 : vector<1x8x512xf32> to vector<8x512xf32>
    %cst_36 = arith.constant dense<0.000000e+00> : vector<8x512xf32>
    %146 = tpu.matmul %141, %3, %cst_36 {dimension_numbers = #tpu.dot_dimension_numbers<[1], [0], [0], [1], [0, 0, 1, 1], [], []>} : vector<8x128xf32>, vector<128x512xf32>, vector<8x512xf32> -> vector<8x512xf32>
    %147 = arith.addf %145, %146 : vector<8x512xf32>
    %148 = vector.extract_strided_slice %147 {offsets = [0, 0], sizes = [8, 128], strides = [1, 1]} : vector<8x512xf32> to vector<8x128xf32>
    %149 = arith.negf %148 : vector<8x128xf32>
    %150 = math.exp %149 : vector<8x128xf32>
    %cst_37 = arith.constant 1.000000e+00 : f32
    %151 = vector.broadcast %cst_37 : f32 to vector<8x128xf32>
    %152 = arith.addf %151, %150 : vector<8x128xf32>
    %153 = arith.divf %151, %152 : vector<8x128xf32>
    %154 = vector.extract_strided_slice %147 {offsets = [0, 128], sizes = [8, 128], strides = [1, 1]} : vector<8x512xf32> to vector<8x128xf32>
    %155 = arith.negf %154 : vector<8x128xf32>
    %156 = math.exp %155 : vector<8x128xf32>
    %cst_38 = arith.constant 1.000000e+00 : f32
    %157 = vector.broadcast %cst_38 : f32 to vector<8x128xf32>
    %158 = arith.addf %157, %156 : vector<8x128xf32>
    %159 = arith.divf %157, %158 : vector<8x128xf32>
    %160 = vector.extract_strided_slice %147 {offsets = [0, 256], sizes = [8, 128], strides = [1, 1]} : vector<8x512xf32> to vector<8x128xf32>
    %161 = math.tanh %160 : vector<8x128xf32>
    %162 = vector.extract_strided_slice %147 {offsets = [0, 384], sizes = [8, 128], strides = [1, 1]} : vector<8x512xf32> to vector<8x128xf32>
    %163 = arith.negf %162 : vector<8x128xf32>
    %164 = math.exp %163 : vector<8x128xf32>
    %cst_39 = arith.constant 1.000000e+00 : f32
    %165 = vector.broadcast %cst_39 : f32 to vector<8x128xf32>
    %166 = arith.addf %165, %164 : vector<8x128xf32>
    %167 = arith.divf %165, %166 : vector<8x128xf32>
    %168 = arith.mulf %159, %142 : vector<8x128xf32>
    %169 = arith.mulf %153, %161 : vector<8x128xf32>
    %170 = arith.addf %168, %169 : vector<8x128xf32>
    %171 = math.tanh %170 : vector<8x128xf32>
    %172 = arith.mulf %167, %171 : vector<8x128xf32>
    %173 = arith.addi %4, %c4_i32 : i32
    %c8_i32_40 = arith.constant 8 : i32
    %174 = arith.cmpi slt, %173, %c8_i32_40 : i32
    %175 = arith.select %174, %172, %141 : vector<8x128xf32>
    %176 = arith.select %174, %170, %142 : vector<8x128xf32>
    %c5_i32 = arith.constant 5 : i32
    %177 = arith.index_cast %c5_i32 : i32 to index
    %c0_41 = arith.constant 0 : index
    %c0_42 = arith.constant 0 : index
    %178 = vector.load %arg1[%177, %c0_41, %c0_42] : memref<8x8x512xf32, #tpu.memory_space<vmem>>, vector<1x8x512xf32>
    %179 = vector.shape_cast %178 : vector<1x8x512xf32> to vector<8x512xf32>
    %cst_43 = arith.constant dense<0.000000e+00> : vector<8x512xf32>
    %180 = tpu.matmul %175, %3, %cst_43 {dimension_numbers = #tpu.dot_dimension_numbers<[1], [0], [0], [1], [0, 0, 1, 1], [], []>} : vector<8x128xf32>, vector<128x512xf32>, vector<8x512xf32> -> vector<8x512xf32>
    %181 = arith.addf %179, %180 : vector<8x512xf32>
    %182 = vector.extract_strided_slice %181 {offsets = [0, 0], sizes = [8, 128], strides = [1, 1]} : vector<8x512xf32> to vector<8x128xf32>
    %183 = arith.negf %182 : vector<8x128xf32>
    %184 = math.exp %183 : vector<8x128xf32>
    %cst_44 = arith.constant 1.000000e+00 : f32
    %185 = vector.broadcast %cst_44 : f32 to vector<8x128xf32>
    %186 = arith.addf %185, %184 : vector<8x128xf32>
    %187 = arith.divf %185, %186 : vector<8x128xf32>
    %188 = vector.extract_strided_slice %181 {offsets = [0, 128], sizes = [8, 128], strides = [1, 1]} : vector<8x512xf32> to vector<8x128xf32>
    %189 = arith.negf %188 : vector<8x128xf32>
    %190 = math.exp %189 : vector<8x128xf32>
    %cst_45 = arith.constant 1.000000e+00 : f32
    %191 = vector.broadcast %cst_45 : f32 to vector<8x128xf32>
    %192 = arith.addf %191, %190 : vector<8x128xf32>
    %193 = arith.divf %191, %192 : vector<8x128xf32>
    %194 = vector.extract_strided_slice %181 {offsets = [0, 256], sizes = [8, 128], strides = [1, 1]} : vector<8x512xf32> to vector<8x128xf32>
    %195 = math.tanh %194 : vector<8x128xf32>
    %196 = vector.extract_strided_slice %181 {offsets = [0, 384], sizes = [8, 128], strides = [1, 1]} : vector<8x512xf32> to vector<8x128xf32>
    %197 = arith.negf %196 : vector<8x128xf32>
    %198 = math.exp %197 : vector<8x128xf32>
    %cst_46 = arith.constant 1.000000e+00 : f32
    %199 = vector.broadcast %cst_46 : f32 to vector<8x128xf32>
    %200 = arith.addf %199, %198 : vector<8x128xf32>
    %201 = arith.divf %199, %200 : vector<8x128xf32>
    %202 = arith.mulf %193, %176 : vector<8x128xf32>
    %203 = arith.mulf %187, %195 : vector<8x128xf32>
    %204 = arith.addf %202, %203 : vector<8x128xf32>
    %205 = math.tanh %204 : vector<8x128xf32>
    %206 = arith.mulf %201, %205 : vector<8x128xf32>
    %207 = arith.addi %4, %c5_i32 : i32
    %c8_i32_47 = arith.constant 8 : i32
    %208 = arith.cmpi slt, %207, %c8_i32_47 : i32
    %209 = arith.select %208, %206, %175 : vector<8x128xf32>
    %210 = arith.select %208, %204, %176 : vector<8x128xf32>
    %c6_i32 = arith.constant 6 : i32
    %211 = arith.index_cast %c6_i32 : i32 to index
    %c0_48 = arith.constant 0 : index
    %c0_49 = arith.constant 0 : index
    %212 = vector.load %arg1[%211, %c0_48, %c0_49] : memref<8x8x512xf32, #tpu.memory_space<vmem>>, vector<1x8x512xf32>
    %213 = vector.shape_cast %212 : vector<1x8x512xf32> to vector<8x512xf32>
    %cst_50 = arith.constant dense<0.000000e+00> : vector<8x512xf32>
    %214 = tpu.matmul %209, %3, %cst_50 {dimension_numbers = #tpu.dot_dimension_numbers<[1], [0], [0], [1], [0, 0, 1, 1], [], []>} : vector<8x128xf32>, vector<128x512xf32>, vector<8x512xf32> -> vector<8x512xf32>
    %215 = arith.addf %213, %214 : vector<8x512xf32>
    %216 = vector.extract_strided_slice %215 {offsets = [0, 0], sizes = [8, 128], strides = [1, 1]} : vector<8x512xf32> to vector<8x128xf32>
    %217 = arith.negf %216 : vector<8x128xf32>
    %218 = math.exp %217 : vector<8x128xf32>
    %cst_51 = arith.constant 1.000000e+00 : f32
    %219 = vector.broadcast %cst_51 : f32 to vector<8x128xf32>
    %220 = arith.addf %219, %218 : vector<8x128xf32>
    %221 = arith.divf %219, %220 : vector<8x128xf32>
    %222 = vector.extract_strided_slice %215 {offsets = [0, 128], sizes = [8, 128], strides = [1, 1]} : vector<8x512xf32> to vector<8x128xf32>
    %223 = arith.negf %222 : vector<8x128xf32>
    %224 = math.exp %223 : vector<8x128xf32>
    %cst_52 = arith.constant 1.000000e+00 : f32
    %225 = vector.broadcast %cst_52 : f32 to vector<8x128xf32>
    %226 = arith.addf %225, %224 : vector<8x128xf32>
    %227 = arith.divf %225, %226 : vector<8x128xf32>
    %228 = vector.extract_strided_slice %215 {offsets = [0, 256], sizes = [8, 128], strides = [1, 1]} : vector<8x512xf32> to vector<8x128xf32>
    %229 = math.tanh %228 : vector<8x128xf32>
    %230 = vector.extract_strided_slice %215 {offsets = [0, 384], sizes = [8, 128], strides = [1, 1]} : vector<8x512xf32> to vector<8x128xf32>
    %231 = arith.negf %230 : vector<8x128xf32>
    %232 = math.exp %231 : vector<8x128xf32>
    %cst_53 = arith.constant 1.000000e+00 : f32
    %233 = vector.broadcast %cst_53 : f32 to vector<8x128xf32>
    %234 = arith.addf %233, %232 : vector<8x128xf32>
    %235 = arith.divf %233, %234 : vector<8x128xf32>
    %236 = arith.mulf %227, %210 : vector<8x128xf32>
    %237 = arith.mulf %221, %229 : vector<8x128xf32>
    %238 = arith.addf %236, %237 : vector<8x128xf32>
    %239 = math.tanh %238 : vector<8x128xf32>
    %240 = arith.mulf %235, %239 : vector<8x128xf32>
    %241 = arith.addi %4, %c6_i32 : i32
    %c8_i32_54 = arith.constant 8 : i32
    %242 = arith.cmpi slt, %241, %c8_i32_54 : i32
    %243 = arith.select %242, %240, %209 : vector<8x128xf32>
    %244 = arith.select %242, %238, %210 : vector<8x128xf32>
    %c7_i32 = arith.constant 7 : i32
    %245 = arith.index_cast %c7_i32 : i32 to index
    %c0_55 = arith.constant 0 : index
    %c0_56 = arith.constant 0 : index
    %246 = vector.load %arg1[%245, %c0_55, %c0_56] : memref<8x8x512xf32, #tpu.memory_space<vmem>>, vector<1x8x512xf32>
    %247 = vector.shape_cast %246 : vector<1x8x512xf32> to vector<8x512xf32>
    %cst_57 = arith.constant dense<0.000000e+00> : vector<8x512xf32>
    %248 = tpu.matmul %243, %3, %cst_57 {dimension_numbers = #tpu.dot_dimension_numbers<[1], [0], [0], [1], [0, 0, 1, 1], [], []>} : vector<8x128xf32>, vector<128x512xf32>, vector<8x512xf32> -> vector<8x512xf32>
    %249 = arith.addf %247, %248 : vector<8x512xf32>
    %250 = vector.extract_strided_slice %249 {offsets = [0, 0], sizes = [8, 128], strides = [1, 1]} : vector<8x512xf32> to vector<8x128xf32>
    %251 = arith.negf %250 : vector<8x128xf32>
    %252 = math.exp %251 : vector<8x128xf32>
    %cst_58 = arith.constant 1.000000e+00 : f32
    %253 = vector.broadcast %cst_58 : f32 to vector<8x128xf32>
    %254 = arith.addf %253, %252 : vector<8x128xf32>
    %255 = arith.divf %253, %254 : vector<8x128xf32>
    %256 = vector.extract_strided_slice %249 {offsets = [0, 128], sizes = [8, 128], strides = [1, 1]} : vector<8x512xf32> to vector<8x128xf32>
    %257 = arith.negf %256 : vector<8x128xf32>
    %258 = math.exp %257 : vector<8x128xf32>
    %cst_59 = arith.constant 1.000000e+00 : f32
    %259 = vector.broadcast %cst_59 : f32 to vector<8x128xf32>
    %260 = arith.addf %259, %258 : vector<8x128xf32>
    %261 = arith.divf %259, %260 : vector<8x128xf32>
    %262 = vector.extract_strided_slice %249 {offsets = [0, 256], sizes = [8, 128], strides = [1, 1]} : vector<8x512xf32> to vector<8x128xf32>
    %263 = math.tanh %262 : vector<8x128xf32>
    %264 = vector.extract_strided_slice %249 {offsets = [0, 384], sizes = [8, 128], strides = [1, 1]} : vector<8x512xf32> to vector<8x128xf32>
    %265 = arith.negf %264 : vector<8x128xf32>
    %266 = math.exp %265 : vector<8x128xf32>
    %cst_60 = arith.constant 1.000000e+00 : f32
    %267 = vector.broadcast %cst_60 : f32 to vector<8x128xf32>
    %268 = arith.addf %267, %266 : vector<8x128xf32>
    %269 = arith.divf %267, %268 : vector<8x128xf32>
    %270 = arith.mulf %261, %244 : vector<8x128xf32>
    %271 = arith.mulf %255, %263 : vector<8x128xf32>
    %272 = arith.addf %270, %271 : vector<8x128xf32>
    %273 = math.tanh %272 : vector<8x128xf32>
    %274 = arith.mulf %269, %273 : vector<8x128xf32>
    %275 = arith.addi %4, %c7_i32 : i32
    %c8_i32_61 = arith.constant 8 : i32
    %276 = arith.cmpi slt, %275, %c8_i32_61 : i32
    %277 = arith.select %276, %274, %243 : vector<8x128xf32>
    %278 = arith.select %276, %272, %244 : vector<8x128xf32>
    %c8_i32_62 = arith.constant 8 : i32
    %c0_63 = arith.constant 0 : index
    %c0_64 = arith.constant 0 : index
    %279 = vector.load %arg6[%c0_63, %c0_64] : memref<8x128xf32, #tpu.memory_space<vmem>>, vector<8x128xf32>
    tpu.vector_store %arg6[%c0_63, %c0_64], %277 {strides = array<i32>} : memref<8x128xf32, #tpu.memory_space<vmem>>, vector<8x128xf32>,
    %c0_65 = arith.constant 0 : index
    %c0_66 = arith.constant 0 : index
    %280 = vector.load %arg7[%c0_65, %c0_66] : memref<8x128xf32, #tpu.memory_space<vmem>>, vector<8x128xf32>
    tpu.vector_store %arg7[%c0_65, %c0_66], %278 {strides = array<i32>} : memref<8x128xf32, #tpu.memory_space<vmem>>, vector<8x128xf32>,
    %c0_i32_67 = arith.constant 0 : i32
    %281 = arith.cmpi eq, %arg0, %c0_i32_67 : i32
    %282 = arith.extui %281 : i1 to i32
    %c0_i32_68 = arith.constant 0 : i32
    %283 = arith.cmpi ne, %282, %c0_i32_68 : i32
    scf.if %283 {
      %c0_69 = arith.constant 0 : index
      %c0_70 = arith.constant 0 : index
      %284 = vector.load %arg3[%c0_69, %c0_70] : memref<128x128xf32, #tpu.memory_space<vmem>>, vector<128x128xf32>
      %cst_71 = arith.constant dense<0.000000e+00> : vector<8x128xf32>
      %285 = tpu.matmul %277, %284, %cst_71 {dimension_numbers = #tpu.dot_dimension_numbers<[1], [0], [0], [1], [0, 0, 1, 1], [], []>} : vector<8x128xf32>, vector<128x128xf32>, vector<8x128xf32> -> vector<8x128xf32>
      %c0_72 = arith.constant 0 : index
      %c0_73 = arith.constant 0 : index
      %286 = vector.load %arg4[%c0_72, %c0_73] : memref<1x128xf32, #tpu.memory_space<vmem>>, vector<1x128xf32>
      %287 = vector.broadcast %286 : vector<1x128xf32> to vector<8x128xf32>
      %288 = arith.addf %285, %287 : vector<8x128xf32>
      %c0_74 = arith.constant 0 : index
      %c0_75 = arith.constant 0 : index
      %289 = vector.load %arg5[%c0_74, %c0_75] : memref<8x128xf32, #tpu.memory_space<vmem>>, vector<8x128xf32>
      tpu.vector_store %arg5[%c0_74, %c0_75], %288 {strides = array<i32>} : memref<8x128xf32, #tpu.memory_space<vmem>>, vector<8x128xf32>,
    } else {
    }
    return
  }
  func.func @transform_0(%arg0: i32) -> (i32, i32, i32) {
    %c0_i32 = arith.constant 0 : i32
    %c0_i32_0 = arith.constant 0 : i32
    %c0_i32_1 = arith.constant 0 : i32
    return %arg0, %c0_i32, %c0_i32_0 : i32, i32, i32
  }
  func.func @transform_1(%arg0: i32) -> (i32, i32) {
    %c0_i32 = arith.constant 0 : i32
    %c0_i32_0 = arith.constant 0 : i32
    %c0_i32_1 = arith.constant 0 : i32
    return %c0_i32, %c0_i32_0 : i32, i32
  }
  func.func @transform_2(%arg0: i32) -> (i32, i32) {
    %c0_i32 = arith.constant 0 : i32
    %c0_i32_0 = arith.constant 0 : i32
    %c0_i32_1 = arith.constant 0 : i32
    return %c0_i32, %c0_i32_0 : i32, i32
  }
  func.func @transform_3(%arg0: i32) -> (i32, i32) {
    %c0_i32 = arith.constant 0 : i32
    %c0_i32_0 = arith.constant 0 : i32
    %c0_i32_1 = arith.constant 0 : i32
    return %c0_i32, %c0_i32_0 : i32, i32
  }
  func.func @transform_4(%arg0: i32) -> (i32, i32) {
    %c0_i32 = arith.constant 0 : i32
    %c0_i32_0 = arith.constant 0 : i32
    %c0_i32_1 = arith.constant 0 : i32
    return %c0_i32, %c0_i32_0 : i32, i32
  }
}

</mosaic_0001>

<bundles_post_ra>
// kernel: tpu_custom_call.1
= control target key start
LH: loop header
LB: loop body
LE: loop exit
PB: predicated region body
PF: predicated region fallthrough
CT: control target
= control target key end

     0   :  { %9 = vsyncpa [#allocation5], 0  ;;  %s3008_s0 = inlined_call_operand.hbm [shape: f32[8,8,512], index: 0, kind: input, shape index: {}]   ;;  %s3009_s1 = inlined_call_operand.hbm [shape: f32[128,512], index: 1, kind: input, shape index: {}]   ;;  %s3010_s2 = inlined_call_operand.hbm [shape: f32[128,128], index: 2, kind: input, shape index: {}]   ;;  %s3011_s3 = inlined_call_operand.vmem [shape: f32[1,128], index: 3, kind: input, shape index: {}]   ;;  %s3012_s4 = inlined_call_operand.hbm [shape: f32[8,128], index: 4, kind: output, shape index: {}]  }
   0x1   :  { %10 = vsyncpa [#allocation8], 0 }
   0x2   :  { %11 = vsyncpa [#allocation6], 0  ;;  %s2547_s15 = smov [#allocation7]   ;;  %s2548_s17 = smov [#allocation4]  }
   0x3   :  { %s29_s16 = sshll.u32 %s2547_s15, 4  ;;  %s17_s18 = sshll.u32 %s2548_s17, 4  ;;  %s30_s16 = int_to_ptr.vmem [resolvable:$true] %s29_s16  ;;  %s2583_s18 = int_to_ptr.vmem [resolvable:$true] %s17_s18 }
   0x4   :  { %s2453_s21 = scalar_lea.hbm %s3009_s1, 8192 }
   0x5   :  { %p2454_p0 = scmp.ne.s32.totalorder %s3009_s1, %s2453_s21  ;;  %p2457_p1 = scmp.lt.u32.totalorder %s2453_s21, %s3009_s1 }
   0x7   :  { %p2459_p2 = pnand %p2457_p1, %p2454_p0 }
   0x9   :  { %2462 = shalt.err (!%p2459_p2)
}
   0xa   :  { %s2463_s26 = scalar_lea.vmem %s30_s16, 8192  ;;  %p2468_p4 = scmp.lt.s32.totalorder %s30_s16, %s30_s16 }
   0xb   :  { %p2464_p3 = scmp.ne.s32.totalorder %s30_s16, %s2463_s26  ;;  %p2469_p5 = scmp.lt.s32.totalorder %s2463_s26, %s2463_s26 }
   0xd   :  { %p2470_p6 = por %p2469_p5, %p2468_p4 }
   0xf   :  { %p2471_p7 = pnand %p2470_p6, %p2464_p3 }
  0x11   :  { %2474 = shalt.err (!%p2471_p7)
}
  0x12   :  { %s2549_s27 = smov 512   ;;  %s2550_s28 = smov 32  }
  0x13   :  { %35 = dma.hbm_to_vmem [thread:$0]  %s3009_s1, 8192, %s30_s16, [#allocation8], %s2549_s27, %s2549_s27, %s2550_s28  }
  0x14   :  { %s2475_s7 = scalar_lea.hbm %s3008_s0, 4096 }
  0x15   :  { %p2476_p8 = scmp.ne.s32.totalorder %s3008_s0, %s2475_s7  ;;  %p2479_p9 = scmp.lt.u32.totalorder %s2475_s7, %s3008_s0 }
  0x17   :  { %p2481_p10 = pnand %p2479_p9, %p2476_p8 }
  0x19   :  { %2484 = shalt.err (!%p2481_p10)
}
  0x1a   :  { %s2485_s12 = scalar_lea.vmem %s2583_s18, 4096  ;;  %p2490_p12 = scmp.lt.s32.totalorder %s2583_s18, %s2583_s18 }
  0x1b   :  { %p2486_p11 = scmp.ne.s32.totalorder %s2583_s18, %s2485_s12  ;;  %p2491_p13 = scmp.lt.s32.totalorder %s2485_s12, %s2485_s12 }
  0x1d   :  { %p2492_p0 = por %p2491_p13, %p2490_p12 }
  0x1f   :  { %p2493_p1 = pnand %p2492_p0, %p2486_p11 }
  0x21   :  { %2496 = shalt.err (!%p2493_p1)
}
  0x22   :  { %23 = dma.hbm_to_vmem [thread:$0]  %s3008_s0, 4096, %s2583_s18, [#allocation5], %s2549_s27, %s2549_s27, %s2550_s28  }
  0x23   :  { %s2551_s14 = smov [#allocation9]   ;;  %s2497_s19 = scalar_lea.hbm %s3010_s2, 2048 }
  0x24   :  { %s41_s15 = sshll.u32 %s2551_s14, 4  ;;  %p2498_p2 = scmp.ne.s32.totalorder %s3010_s2, %s2497_s19  ;;  %s42_s15 = int_to_ptr.vmem [resolvable:$true] %s41_s15 }
  0x25   :  { %p2501_p3 = scmp.lt.u32.totalorder %s2497_s19, %s3010_s2 }
  0x27   :  { %p2503_p4 = pnand %p2501_p3, %p2498_p2 }
  0x29   :  { %2506 = shalt.err (!%p2503_p4)
}
  0x2a   :  { %s2507_s24 = scalar_lea.vmem %s42_s15, 2048  ;;  %p2512_p6 = scmp.lt.s32.totalorder %s42_s15, %s42_s15 }
  0x2b   :  { %p2508_p5 = scmp.ne.s32.totalorder %s42_s15, %s2507_s24  ;;  %p2513_p7 = scmp.lt.s32.totalorder %s2507_s24, %s2507_s24 }
  0x2d   :  { %p2514_p8 = por %p2513_p7, %p2512_p6 }
  0x2f   :  { %p2515_p9 = pnand %p2514_p8, %p2508_p5 }
  0x31   :  { %2518 = shalt.err (!%p2515_p9)
}
  0x32   :  { %s2552_s0 = smov 128   ;;  %s2553_s18 = smov 8  }
  0x33   :  { %47 = dma.hbm_to_vmem [thread:$0]  %s3010_s2, 2048, %s42_s15, [#allocation8], %s2552_s0, %s2552_s0, %s2553_s18  }
  0x34   :  { %2541 = dma.done.wait [#allocation5], 4096  }
  0x35   :  { %2542 = vsyncadd [#allocation5], 4294963200 }
  0x36   :  { %2543 = dma.done.wait [#allocation8], 10240  }
  0x37   :  { %2544 = vsyncadd [#allocation8], 4294957056  ;;  %v2554_v0 = vmov 0.0   ;;  %v66_v1 = vld [vmem:[#allocation7 + $0x8] sm:$0xff]  ;;  %v65_v3 = vld [vmem:[#allocation7] sm:$0xff]  ;;  %vm2556_vm0 = vmmov 0  }
  0x38   :  { %200 = vmatprep.mubr.f32.mxu0 %v2554_v0  ;;  %271 = vmatprep.mubr.f32.mxu1 %v2554_v0  ;;  %v70_v2 = vld [vmem:[#allocation7 + $0x28] sm:$0xff]  ;;  %v69_v5 = vld [vmem:[#allocation7 + $0x20] sm:$0xff]  ;;  %v68_v19 = vld [vmem:[#allocation7 + $0x18] sm:$0xff]  ;;  %s2557_s28 = smov [#allocation10]  }
  0x39   :  { %v2628_v4 = vpack.c.bf16 %v70_v2, %v66_v1  ;;  %v74_v6 = vld [vmem:[#allocation7 + $0x48] sm:$0xff]  ;;  %v2630_v8 = vpack.c.bf16 %v69_v5, %v65_v3  ;;  %v73_v10 = vld [vmem:[#allocation7 + $0x40] sm:$0xff]  ;;  %v72_v20 = vld [vmem:[#allocation7 + $0x38] sm:$0xff]  ;;  %s1691_s29 = sshll.u32 %s2557_s28, 4  ;;  %s1692_s29 = int_to_ptr.vmem [resolvable:$true] %s1691_s29 }
  0x3a   :  { %v78_v7 = vld [vmem:[#allocation7 + $0x68] sm:$0xff]  ;;  %v77_v11 = vld [vmem:[#allocation7 + $0x60] sm:$0xff]  ;;  %v2641_v22 = vpack.c.bf16 %v72_v20, %v68_v19  ;;  %v67_v23 = vld [vmem:[#allocation7 + $0x10] sm:$0xff]  ;;  %s2519_s30 = scalar_lea.vmem %s1692_s29, 128  ;;  %p2524_p11 = scmp.lt.s32.totalorder %s1692_s29, %s1692_s29 }
  0x3b   :  { %v2632_v9 = vpack.c.bf16 %v78_v7, %v74_v6  ;;  %v82_v12 = vld [vmem:[#allocation7 + $0x88] sm:$0xff]  ;;  %1779 = vmatprep.subr.bf16.mxu0 %v2628_v4  ;;  %v2636_v14 = vpack.c.bf16 %v77_v11, %v73_v10  ;;  %v81_v15 = vld [vmem:[#allocation7 + $0x80] sm:$0xff]  ;;  %v71_v24 = vld [vmem:[#allocation7 + $0x30] sm:$0xff]  ;;  %p2520_p10 = scmp.ne.s32.totalorder %s1692_s29, %s2519_s30  ;;  %p2525_p12 = scmp.lt.s32.totalorder %s2519_s30, %s2519_s30 }
  0x3c   :  { %v86_v13 = vld [vmem:[#allocation7 + $0xa8] sm:$0xff]  ;;  %1781 = vmatpush1.bf16.msra.mxu0 %v2630_v8  ;;  %v85_v16 = vld [vmem:[#allocation7 + $0xa0] sm:$0xff]  ;;  %v2643_v25 = vpack.c.bf16 %v71_v24, %v67_v23  ;;  %1811 = vmatprep.subr.bf16.mxu1 %v2641_v22  ;;  %v76_v27 = vld [vmem:[#allocation7 + $0x58] sm:$0xff] }
  0x3d   :  { %1783 = vmatprep.subr.bf16.mxu0 %v2632_v9  ;;  %v2639_v17 = vpack.c.bf16 %v86_v13, %v82_v12  ;;  %v90_v18 = vld [vmem:[#allocation7 + $0xc8] sm:$0xff]  ;;  %v2646_v26 = vpack.c.bf16 %v85_v16, %v81_v15  ;;  %v80_v28 = vld [vmem:[#allocation7 + $0x78] sm:$0xff]  ;;  %v75_v29 = vld [vmem:[#allocation7 + $0x50] sm:$0xff]  ;;  %p2526_p13 = por %p2525_p12, %p2524_p11 }
  0x3e   :  { %v94_v21 = vld [vmem:[#allocation7 + $0xe8] sm:$0xff]  ;;  %v89_v31 = vld [vmem:[#allocation7 + $0xc0] sm:$0xff]  ;;  %1813 = vmatpush1.bf16.msra.mxu1 %v2643_v25  ;;  %v2653_v33 = vpack.c.bf16 %v80_v28, %v76_v27  ;;  %v79_v34 = vld [vmem:[#allocation7 + $0x70] sm:$0xff] }
  0x3f   :  { %v2650_v30 = vpack.c.bf16 %v94_v21, %v90_v18  ;;  %v93_v32 = vld [vmem:[#allocation7 + $0xe0] sm:$0xff]  ;;  %v98_v35 = vld [vmem:[#allocation7 + $0x108] sm:$0xff]  ;;  %v2655_v37 = vpack.c.bf16 %v79_v34, %v75_v29  ;;  %v84_v38 = vld [vmem:[#allocation7 + $0x98] sm:$0xff]  ;;  %p2527_p0 = pnand %p2526_p13, %p2520_p10 }
  0x40   :  { %1785 = vmatpush1.bf16.msra.mxu0 %v2636_v14  ;;  %v102_v36 = vld [vmem:[#allocation7 + $0x128] sm:$0xff]  ;;  %1815 = vmatprep.subr.bf16.mxu1 %v2653_v33  ;;  %v88_v39 = vld [vmem:[#allocation7 + $0xb8] sm:$0xff]  ;;  %v83_v40 = vld [vmem:[#allocation7 + $0x90] sm:$0xff]  ;;  %v2659_v42 = vpack.c.bf16 %v93_v32, %v89_v31 }
  0x41   :  { %1787 = vmatprep.subr.bf16.mxu0 %v2639_v17  ;;  %v87_v41 = vld [vmem:[#allocation7 + $0xb0] sm:$0xff]  ;;  %v97_v43 = vld [vmem:[#allocation7 + $0x100] sm:$0xff]  ;;  %v2661_v45 = vpack.c.bf16 %v88_v39, %v84_v38  ;;  %v2664_v46 = vpack.c.bf16 %v102_v36, %v98_v35  ;;  %v106_v47 = vld [vmem:[#allocation7 + $0x148] sm:$0xff] }
  0x42   :  { %v101_v44 = vld [vmem:[#allocation7 + $0x120] sm:$0xff]  ;;  %1817 = vmatpush1.bf16.msra.mxu1 %v2655_v37  ;;  %v2667_v48 = vpack.c.bf16 %v87_v41, %v83_v40  ;;  %v92_v49 = vld [vmem:[#allocation7 + $0xd8] sm:$0xff]  ;;  %v110_v51 = vld [vmem:[#allocation7 + $0x168] sm:$0xff] }
  0x43   :  { %v96_v50 = vld [vmem:[#allocation7 + $0xf8] sm:$0xff]  ;;  %1819 = vmatprep.subr.bf16.mxu1 %v2661_v45  ;;  %v91_v53 = vld [vmem:[#allocation7 + $0xd0] sm:$0xff]  ;;  %v2673_v55 = vpack.c.bf16 %v101_v44, %v97_v43  ;;  %v2676_v58 = vpack.c.bf16 %v110_v51, %v106_v47  ;;  %v105_v59 = vld [vmem:[#allocation7 + $0x140] sm:$0xff] }
  0x44   :  { %1789 = vmatpush1.bf16.msra.mxu0 %v2646_v26  ;;  %v2670_v52 = vpack.c.bf16 %v96_v50, %v92_v49  ;;  %v95_v54 = vld [vmem:[#allocation7 + $0xf0] sm:$0xff]  ;;  %v100_v56 = vld [vmem:[#allocation7 + $0x118] sm:$0xff]  ;;  %v109_v60 = vld [vmem:[#allocation7 + $0x160] sm:$0xff] }
  0x45   :  { %1791 = vmatprep.subr.bf16.mxu0 %v2650_v30  ;;  %v104_v57 = vld [vmem:[#allocation7 + $0x138] sm:$0xff]  ;;  %v114_v61 = vld [vmem:[#allocation7 + $0x188] sm:$0xff]  ;;  %v2679_v62 = vpack.c.bf16 %v95_v54, %v91_v53  ;;  %v99_v2 = vld [vmem:[#allocation7 + $0x110] sm:$0xff]  ;;  %v2685_v7 = vpack.c.bf16 %v109_v60, %v105_v59 }
  0x46   :  { %1821 = vmatpush1.bf16.msra.mxu1 %v2667_v48  ;;  %v118_v63 = vld [vmem:[#allocation7 + $0x1a8] sm:$0xff]  ;;  %v2682_v1 = vpack.c.bf16 %v104_v57, %v100_v56  ;;  %v103_v3 = vld [vmem:[#allocation7 + $0x130] sm:$0xff]  ;;  %v108_v5 = vld [vmem:[#allocation7 + $0x158] sm:$0xff] }
  0x47   :  { %1823 = vmatprep.subr.bf16.mxu1 %v2670_v52  ;;  %v112_v6 = vld [vmem:[#allocation7 + $0x178] sm:$0xff]  ;;  %v2688_v10 = vpack.c.bf16 %v118_v63, %v114_v61  ;;  %v113_v11 = vld [vmem:[#allocation7 + $0x180] sm:$0xff]  ;;  %v122_v13 = vld [vmem:[#allocation7 + $0x1c8] sm:$0xff]  ;;  %v2691_v15 = vpack.c.bf16 %v103_v3, %v99_v2 }
  0x48   :  { %1793 = vmatpush1.bf16.msra.mxu0 %v2659_v42  ;;  %v117_v12 = vld [vmem:[#allocation7 + $0x1a0] sm:$0xff]  ;;  %v126_v16 = vld [vmem:[#allocation7 + $0x1e8] sm:$0xff]  ;;  %v2694_v18 = vpack.c.bf16 %v112_v6, %v108_v5  ;;  %v107_v19 = vld [vmem:[#allocation7 + $0x150] sm:$0xff] }
  0x49   :  { %1795 = vmatprep.subr.bf16.mxu0 %v2664_v46  ;;  %v111_v20 = vld [vmem:[#allocation7 + $0x170] sm:$0xff]  ;;  %v116_v21 = vld [vmem:[#allocation7 + $0x198] sm:$0xff]  ;;  %v2697_v24 = vpack.c.bf16 %v117_v12, %v113_v11  ;;  %v2700_v27 = vpack.c.bf16 %v126_v16, %v122_v13  ;;  %v121_v28 = vld [vmem:[#allocation7 + $0x1c0] sm:$0xff] }
  0x4a   :  { %1825 = vmatpush1.bf16.msra.mxu1 %v2679_v62  ;;  %v120_v23 = vld [vmem:[#allocation7 + $0x1b8] sm:$0xff]  ;;  %v125_v29 = vld [vmem:[#allocation7 + $0x1e0] sm:$0xff]  ;;  %v2703_v31 = vpack.c.bf16 %v111_v20, %v107_v19  ;;  %v115_v34 = vld [vmem:[#allocation7 + $0x190] sm:$0xff] }
  0x4b   :  { %1827 = vmatprep.subr.bf16.mxu1 %v2682_v1  ;;  %v2706_v32 = vpack.c.bf16 %v120_v23, %v116_v21  ;;  %v119_v35 = vld [vmem:[#allocation7 + $0x1b0] sm:$0xff]  ;;  %v124_v36 = vld [vmem:[#allocation7 + $0x1d8] sm:$0xff]  ;;  %v2709_v39 = vpack.c.bf16 %v125_v29, %v121_v28  ;;  %v132_v49 = vld [vmem:[#allocation4] sm:$0xff] }
  0x4c   :  { %1797 = vmatpush1.bf16.msra.mxu0 %v2673_v55  ;;  %v128_v38 = vld [vmem:[#allocation7 + $0x1f8] sm:$0xff]  ;;  %v2713_v40 = vpack.c.bf16 %v119_v35, %v115_v34  ;;  %v123_v43 = vld [vmem:[#allocation7 + $0x1d0] sm:$0xff]  ;;  %v133_v50 = vld [vmem:[#allocation4 + $0x8] sm:$0xff] }
  0x4d   :  { %1799 = vmatprep.subr.bf16.mxu0 %v2676_v58  ;;  %v2716_v41 = vpack.c.bf16 %v128_v38, %v124_v36  ;;  %v127_v44 = vld [vmem:[#allocation7 + $0x1f0] sm:$0xff]  ;;  %v135_v60 = vld [vmem:[#allocation4 + $0x18] sm:$0xff] }
  0x4e   :  { %1829 = vmatpush1.bf16.msra.mxu1 %v2691_v15  ;;  %v2720_v47 = vpack.c.bf16 %v127_v44, %v123_v43  ;;  %v134_v3 = vld [vmem:[#allocation4 + $0x10] sm:$0xff]  ;;  %v313_v44 = vld [vmem:[#allocation4 + $0x20] sm:$0xff] }
  0x4f   :  { %1831 = vmatprep.subr.bf16.mxu1 %v2694_v18 }
  0x50   :  { %1801 = vmatpush1.bf16.msra.mxu0 %v2685_v7 }
  0x51   :  { %1803 = vmatprep.subr.bf16.mxu0 %v2688_v10 }
  0x52   :  { %1833 = vmatpush1.bf16.msra.mxu1 %v2703_v31 }
  0x53   :  { %1835 = vmatprep.subr.bf16.mxu1 %v2706_v32 }
  0x54   :  { %1805 = vmatpush1.bf16.msra.mxu0 %v2697_v24 }
  0x55   :  { %1807 = vmatprep.subr.bf16.mxu0 %v2700_v27 }
  0x56   :  { %1837 = vmatpush1.bf16.msra.mxu1 %v2713_v40 }
  0x57   :  { %1839 = vmatprep.subr.bf16.mxu1 %v2716_v41 }
  0x58   :  { %1809 = vmatpush1.bf16.msra.mxu0 %v2709_v39 }
  0x59   :  { %1843 = vmatprep.subr.bf16.mxu0 %v2628_v4 }
  0x5a   :  { %1841 = vmatpush1.bf16.msra.mxu1 %v2720_v47 }
  0x5b   :  { %201 = vmatmul.mubr.f32.vlgmr.msra.gmra.mrb[0].mxu0 %v2554_v0  ;;  %1875 = vmatprep.subr.bf16.mxu1 %v2641_v22 }
  0x5c   :  { %1845 = vmatpush1.bf16.msra.mxu0 %v2630_v8  ;;  %381 = vmatprep.mubr.f32.mxu0 %v2554_v0 }
  0x5d   :  { %1847 = vmatprep.subr.bf16.mxu0 %v2632_v9  ;;  %272 = vmatmul.mubr.f32.vlgmr.msra.gmra.mrb[0].mxu1 %v2554_v0 }
  0x5e   :  { %1877 = vmatpush1.bf16.msra.mxu1 %v2643_v25  ;;  %452 = vmatprep.mubr.f32.mxu1 %v2554_v0 }
  0x5f   :  { %1879 = vmatprep.subr.bf16.mxu1 %v2653_v33 }
  0x60   :  { %1849 = vmatpush1.bf16.msra.mxu0 %v2636_v14 }
  0x61   :  { %1851 = vmatprep.subr.bf16.mxu0 %v2639_v17 }
  0x62   :  { %1881 = vmatpush1.bf16.msra.mxu1 %v2655_v37 }
  0x63   :  { %1883 = vmatprep.subr.bf16.mxu1 %v2661_v45 }
  0x64   :  { %1853 = vmatpush1.bf16.msra.mxu0 %v2646_v26 }
  0x65   :  { %1855 = vmatprep.subr.bf16.mxu0 %v2650_v30 }
  0x66   :  { %1885 = vmatpush1.bf16.msra.mxu1 %v2667_v48 }
  0x67   :  { %1887 = vmatprep.subr.bf16.mxu1 %v2670_v52 }
  0x68   :  { %1857 = vmatpush1.bf16.msra.mxu0 %v2659_v42 }
  0x69   :  { %1859 = vmatprep.subr.bf16.mxu0 %v2664_v46 }
  0x6a   :  { %1889 = vmatpush1.bf16.msra.mxu1 %v2679_v62 }
  0x6b   :  { %1891 = vmatprep.subr.bf16.mxu1 %v2682_v1 }
  0x6c   :  { %1861 = vmatpush1.bf16.msra.mxu0 %v2673_v55 }
  0x6d   :  { %1863 = vmatprep.subr.bf16.mxu0 %v2676_v58 }
  0x6e   :  { %1893 = vmatpush1.bf16.msra.mxu1 %v2691_v15 }
  0x6f   :  { %1895 = vmatprep.subr.bf16.mxu1 %v2694_v18 }
  0x70   :  { %1865 = vmatpush1.bf16.msra.mxu0 %v2685_v7 }
  0x71   :  { %1867 = vmatprep.subr.bf16.mxu0 %v2688_v10 }
  0x72   :  { %1897 = vmatpush1.bf16.msra.mxu1 %v2703_v31 }
  0x73   :  { %1899 = vmatprep.subr.bf16.mxu1 %v2706_v32 }
  0x74   :  { %1869 = vmatpush1.bf16.msra.mxu0 %v2697_v24 }
  0x75   :  { %1871 = vmatprep.subr.bf16.mxu0 %v2700_v27 }
  0x76   :  { %1901 = vmatpush1.bf16.msra.mxu1 %v2713_v40 }
  0x77   :  { %1903 = vmatprep.subr.bf16.mxu1 %v2716_v41 }
  0x78   :  { %1873 = vmatpush1.bf16.msra.mxu0 %v2709_v39 }
  0x79   :  { %1907 = vmatprep.subr.bf16.mxu0 %v2628_v4 }
  0x7a   :  { %1905 = vmatpush1.bf16.msra.mxu1 %v2720_v47 }
  0x7b   :  { %1939 = vmatprep.subr.bf16.mxu1 %v2641_v22 }
 0x12e   :  { %v202_v51 = vpop.f32.mrb[0].mxu0 }
 0x12f   :  { %v278_v53 = vadd.f32 %v202_v51, %v132_v49  ;;  %v204_v54 = vpop.f32.mrb[1].mxu0  ;;  %v314_v49 = vld [vmem:[#allocation4 + $0x28] sm:$0xff] }
 0x130   :  { %v279_v56 = vadd.f32 %v204_v54, %v133_v50  ;;  %v273_v61 = vpop.f32.mrb[0].mxu1 }
 0x131   :  { %v1701_v57 = vmul.f32 -1.442695, %v278_v53  ;;  %v275_v63 = vpop.f32.mrb[1].mxu1  ;;  %v280_v6 = vadd.f32 %v273_v61, %v134_v3  ;;  %v316_v61 = vld [vmem:[#allocation4 + $0x38] sm:$0xff] }
 0x132   :  { %v1702_v59 = vmul.f32 -1.442695, %v279_v56  ;;  %v281_v2 = vadd.f32 %v275_v63, %v135_v60 }
 0x133   :  { %2325 = vpow2.f32 %v1701_v57 }
 0x134   :  { %2327 = vpow2.f32 %v1702_v59  ;;  %v1703_v5 = vmul.f32 -1.442695, %v281_v2  ;;  %v315_v2 = vld [vmem:[#allocation4 + $0x30] sm:$0xff] }
 0x136   :  { %2329 = vpow2.f32 %v1703_v5 }
 0x137   :  { %2331 = vtanh.f32 %v280_v6 }
 0x13d   :  { %v2326_v11 = vpop.eup %2325 }
 0x13e   :  { %v2328_v12 = vpop.eup %2327  ;;  %v285_v13 = vadd.f32 1.0, %v2326_v11 }
 0x13f   :  { %v291_v16 = vadd.f32 1.0, %v2328_v12 }
 0x140   :  { %2333 = vrcp.f32 %v285_v13  ;;  %v2330_v19 = vpop.eup %2329 }
 0x141   :  { %2335 = vrcp.f32 %v291_v16  ;;  %v2332_v20 = vpop.eup %2331  ;;  %v298_v23 = vadd.f32 1.0, %v2330_v19 }
 0x143   :  { %2337 = vrcp.f32 %v298_v23 }
 0x14a   :  { %v2334_v21 = vpop.eup %2333 }
 0x14b   :  { %v2336_v28 = vpop.eup %2335  ;;  %v302_v29 = vmul.f32 %v2334_v21, %v2332_v20 }
 0x14c   :  { %v301_v34 = vmul.f32 0.0, %v2336_v28 }
 0x14d   :  { %v2338_v36 = vpop.eup %2337 }
 0x14e   :  { %v2762_v35 = vadd.f32 %v302_v29, %v301_v34 }
 0x150   :  { %2339 = vtanh.f32 %v2762_v35 }
 0x15a   :  { %v2340_v38 = vpop.eup %2339 }
 0x15b   :  { %v305_v43 = vmul.f32 %v2340_v38, %v2338_v36 }
 0x15d   :  { %382 = vmatmul.mubr.f32.vlgmr.msra.gmra.mrb[2].mxu0 %v305_v43  ;;  %453 = vmatmul.mubr.f32.vlgmr.msra.gmra.mrb[2].mxu1 %v305_v43 }
 0x15e   :  { %1909 = vmatpush1.bf16.msra.mxu0 %v2630_v8  ;;  %1941 = vmatpush1.bf16.msra.mxu1 %v2643_v25 }
 0x15f   :  { %1911 = vmatprep.subr.bf16.mxu0 %v2632_v9  ;;  %1943 = vmatprep.subr.bf16.mxu1 %v2653_v33 }
 0x160   :  { %563 = vmatprep.mubr.f32.mxu0 %v2554_v0  ;;  %634 = vmatprep.mubr.f32.mxu1 %v2554_v0 }
 0x162   :  { %1913 = vmatpush1.bf16.msra.mxu0 %v2636_v14  ;;  %1945 = vmatpush1.bf16.msra.mxu1 %v2655_v37 }
 0x163   :  { %1915 = vmatprep.subr.bf16.mxu0 %v2639_v17  ;;  %1947 = vmatprep.subr.bf16.mxu1 %v2661_v45 }
 0x166   :  { %1917 = vmatpush1.bf16.msra.mxu0 %v2646_v26  ;;  %1949 = vmatpush1.bf16.msra.mxu1 %v2667_v48 }
 0x167   :  { %1919 = vmatprep.subr.bf16.mxu0 %v2650_v30  ;;  %1951 = vmatprep.subr.bf16.mxu1 %v2670_v52 }
 0x16a   :  { %1921 = vmatpush1.bf16.msra.mxu0 %v2659_v42  ;;  %1953 = vmatpush1.bf16.msra.mxu1 %v2679_v62 }
 0x16b   :  { %1923 = vmatprep.subr.bf16.mxu0 %v2664_v46  ;;  %1955 = vmatprep.subr.bf16.mxu1 %v2682_v1 }
 0x16e   :  { %1925 = vmatpush1.bf16.msra.mxu0 %v2673_v55  ;;  %1957 = vmatpush1.bf16.msra.mxu1 %v2691_v15 }
 0x16f   :  { %1927 = vmatprep.subr.bf16.mxu0 %v2676_v58  ;;  %1959 = vmatprep.subr.bf16.mxu1 %v2694_v18 }
 0x172   :  { %1929 = vmatpush1.bf16.msra.mxu0 %v2685_v7  ;;  %1961 = vmatpush1.bf16.msra.mxu1 %v2703_v31 }
 0x173   :  { %1931 = vmatprep.subr.bf16.mxu0 %v2688_v10  ;;  %1963 = vmatprep.subr.bf16.mxu1 %v2706_v32 }
 0x176   :  { %1933 = vmatpush1.bf16.msra.mxu0 %v2697_v24  ;;  %1965 = vmatpush1.bf16.msra.mxu1 %v2713_v40 }
 0x177   :  { %1935 = vmatprep.subr.bf16.mxu0 %v2700_v27  ;;  %1967 = vmatprep.subr.bf16.mxu1 %v2716_v41 }
 0x17a   :  { %1937 = vmatpush1.bf16.msra.mxu0 %v2709_v39  ;;  %1969 = vmatpush1.bf16.msra.mxu1 %v2720_v47 }
 0x17b   :  { %1971 = vmatprep.subr.bf16.mxu0 %v2628_v4  ;;  %2003 = vmatprep.subr.bf16.mxu1 %v2641_v22 }
 0x230   :  { %v383_v50 = vpop.f32.mrb[2].mxu0  ;;  %v454_v51 = vpop.f32.mrb[2].mxu1 }
 0x231   :  { %v459_v53 = vadd.f32 %v383_v50, %v313_v44  ;;  %v385_v54 = vpop.f32.mrb[3].mxu0  ;;  %v456_v56 = vpop.f32.mrb[3].mxu1  ;;  %v461_v5 = vadd.f32 %v454_v51, %v315_v2  ;;  %v496_v44 = vld [vmem:[#allocation4 + $0x48] sm:$0xff] }
 0x232   :  { %v460_v57 = vadd.f32 %v385_v54, %v314_v49  ;;  %v462_v63 = vadd.f32 %v456_v56, %v316_v61 }
 0x233   :  { %v1704_v59 = vmul.f32 -1.442695, %v459_v53 }
 0x234   :  { %v1705_v60 = vmul.f32 -1.442695, %v460_v57  ;;  %v1706_v3 = vmul.f32 -1.442695, %v462_v63  ;;  %v497_v63 = vld [vmem:[#allocation4 + $0x50] sm:$0xff] }
 0x235   :  { %2341 = vpow2.f32 %v1704_v59 }
 0x236   :  { %2343 = vpow2.f32 %v1705_v60  ;;  %v498_v60 = vld [vmem:[#allocation4 + $0x58] sm:$0xff] }
 0x237   :  { %2345 = vpow2.f32 %v1706_v3 }
 0x238   :  { %2347 = vtanh.f32 %v461_v5 }
 0x23f   :  { %v2342_v6 = vpop.eup %2341 }
 0x240   :  { %v2344_v11 = vpop.eup %2343  ;;  %v466_v12 = vadd.f32 1.0, %v2342_v6 }
 0x241   :  { %v472_v13 = vadd.f32 1.0, %v2344_v11  ;;  %v2346_v16 = vpop.eup %2345 }
 0x242   :  { %2349 = vrcp.f32 %v466_v12  ;;  %v2348_v19 = vpop.eup %2347  ;;  %v479_v28 = vadd.f32 1.0, %v2346_v16 }
 0x243   :  { %2351 = vrcp.f32 %v472_v13 }
 0x244   :  { %2353 = vrcp.f32 %v479_v28 }
 0x24c   :  { %v2350_v20 = vpop.eup %2349 }
 0x24d   :  { %v2352_v21 = vpop.eup %2351  ;;  %v483_v23 = vmul.f32 %v2350_v20, %v2348_v19 }
 0x24e   :  { %v482_v29 = vmul.f32 %v2352_v21, %v2762_v35  ;;  %v2354_v36 = vpop.eup %2353  ;;  %v495_v35 = vld [vmem:[#allocation4 + $0x40] sm:$0xff] }
 0x250   :  { %v2800_v34 = vadd.f32 %v483_v23, %v482_v29 }
 0x252   :  { %2355 = vtanh.f32 %v2800_v34 }
 0x25c   :  { %v2356_v38 = vpop.eup %2355 }
 0x25d   :  { %v486_v43 = vmul.f32 %v2356_v38, %v2354_v36 }
 0x25f   :  { %564 = vmatmul.mubr.f32.vlgmr.msra.gmra.mrb[4].mxu0 %v486_v43  ;;  %635 = vmatmul.mubr.f32.vlgmr.msra.gmra.mrb[4].mxu1 %v486_v43 }
 0x260   :  { %1973 = vmatpush1.bf16.msra.mxu0 %v2630_v8  ;;  %2005 = vmatpush1.bf16.msra.mxu1 %v2643_v25 }
 0x261   :  { %1975 = vmatprep.subr.bf16.mxu0 %v2632_v9  ;;  %2007 = vmatprep.subr.bf16.mxu1 %v2653_v33 }
 0x262   :  { %745 = vmatprep.mubr.f32.mxu0 %v2554_v0  ;;  %816 = vmatprep.mubr.f32.mxu1 %v2554_v0 }
 0x264   :  { %1977 = vmatpush1.bf16.msra.mxu0 %v2636_v14  ;;  %2009 = vmatpush1.bf16.msra.mxu1 %v2655_v37 }
 0x265   :  { %1979 = vmatprep.subr.bf16.mxu0 %v2639_v17  ;;  %2011 = vmatprep.subr.bf16.mxu1 %v2661_v45 }
 0x268   :  { %1981 = vmatpush1.bf16.msra.mxu0 %v2646_v26  ;;  %2013 = vmatpush1.bf16.msra.mxu1 %v2667_v48 }
 0x269   :  { %1983 = vmatprep.subr.bf16.mxu0 %v2650_v30  ;;  %2015 = vmatprep.subr.bf16.mxu1 %v2670_v52 }
 0x26c   :  { %1985 = vmatpush1.bf16.msra.mxu0 %v2659_v42  ;;  %2017 = vmatpush1.bf16.msra.mxu1 %v2679_v62 }
 0x26d   :  { %1987 = vmatprep.subr.bf16.mxu0 %v2664_v46  ;;  %2019 = vmatprep.subr.bf16.mxu1 %v2682_v1 }
 0x270   :  { %1989 = vmatpush1.bf16.msra.mxu0 %v2673_v55  ;;  %2021 = vmatpush1.bf16.msra.mxu1 %v2691_v15 }
 0x271   :  { %1991 = vmatprep.subr.bf16.mxu0 %v2676_v58  ;;  %2023 = vmatprep.subr.bf16.mxu1 %v2694_v18 }
 0x274   :  { %1993 = vmatpush1.bf16.msra.mxu0 %v2685_v7  ;;  %2025 = vmatpush1.bf16.msra.mxu1 %v2703_v31 }
 0x275   :  { %1995 = vmatprep.subr.bf16.mxu0 %v2688_v10  ;;  %2027 = vmatprep.subr.bf16.mxu1 %v2706_v32 }
 0x278   :  { %1997 = vmatpush1.bf16.msra.mxu0 %v2697_v24  ;;  %2029 = vmatpush1.bf16.msra.mxu1 %v2713_v40 }
 0x279   :  { %1999 = vmatprep.subr.bf16.mxu0 %v2700_v27  ;;  %2031 = vmatprep.subr.bf16.mxu1 %v2716_v41 }
 0x27c   :  { %2001 = vmatpush1.bf16.msra.mxu0 %v2709_v39  ;;  %2033 = vmatpush1.bf16.msra.mxu1 %v2720_v47 }
 0x27d   :  { %2035 = vmatprep.subr.bf16.mxu0 %v2628_v4  ;;  %2067 = vmatprep.subr.bf16.mxu1 %v2641_v22 }
 0x332   :  { %v565_v49 = vpop.f32.mrb[4].mxu0  ;;  %v636_v50 = vpop.f32.mrb[4].mxu1 }
 0x333   :  { %v641_v51 = vadd.f32 %v565_v49, %v495_v35  ;;  %v567_v53 = vpop.f32.mrb[5].mxu0  ;;  %v638_v54 = vpop.f32.mrb[5].mxu1  ;;  %v643_v3 = vadd.f32 %v636_v50, %v497_v63  ;;  %v678_v35 = vld [vmem:[#allocation4 + $0x68] sm:$0xff] }
 0x334   :  { %v642_v56 = vadd.f32 %v567_v53, %v496_v44  ;;  %v644_v61 = vadd.f32 %v638_v54, %v498_v60 }
 0x335   :  { %v1707_v57 = vmul.f32 -1.442695, %v641_v51 }
 0x336   :  { %v1708_v59 = vmul.f32 -1.442695, %v642_v56  ;;  %v1709_v2 = vmul.f32 -1.442695, %v644_v61  ;;  %v679_v61 = vld [vmem:[#allocation4 + $0x70] sm:$0xff] }
 0x337   :  { %2357 = vpow2.f32 %v1707_v57 }
 0x338   :  { %2359 = vpow2.f32 %v1708_v59  ;;  %v680_v59 = vld [vmem:[#allocation4 + $0x78] sm:$0xff] }
 0x339   :  { %2361 = vpow2.f32 %v1709_v2 }
 0x33a   :  { %2363 = vtanh.f32 %v643_v3 }
 0x341   :  { %v2358_v5 = vpop.eup %2357 }
 0x342   :  { %v2360_v6 = vpop.eup %2359  ;;  %v648_v11 = vadd.f32 1.0, %v2358_v5 }
 0x343   :  { %v654_v12 = vadd.f32 1.0, %v2360_v6  ;;  %v2362_v13 = vpop.eup %2361 }
 0x344   :  { %2365 = vrcp.f32 %v648_v11  ;;  %v2364_v16 = vpop.eup %2363  ;;  %v661_v23 = vadd.f32 1.0, %v2362_v13 }
 0x345   :  { %2367 = vrcp.f32 %v654_v12 }
 0x346   :  { %2369 = vrcp.f32 %v661_v23 }
 0x34e   :  { %v2366_v19 = vpop.eup %2365 }
 0x34f   :  { %v2368_v20 = vpop.eup %2367  ;;  %v665_v21 = vmul.f32 %v2366_v19, %v2364_v16 }
 0x350   :  { %v664_v28 = vmul.f32 %v2368_v20, %v2800_v34  ;;  %v2370_v36 = vpop.eup %2369  ;;  %v677_v34 = vld [vmem:[#allocation4 + $0x60] sm:$0xff] }
 0x352   :  { %v2838_v29 = vadd.f32 %v665_v21, %v664_v28 }
 0x354   :  { %2371 = vtanh.f32 %v2838_v29 }
 0x35e   :  { %v2372_v38 = vpop.eup %2371 }
 0x35f   :  { %v668_v43 = vmul.f32 %v2372_v38, %v2370_v36 }
 0x361   :  { %746 = vmatmul.mubr.f32.vlgmr.msra.gmra.mrb[6].mxu0 %v668_v43  ;;  %817 = vmatmul.mubr.f32.vlgmr.msra.gmra.mrb[6].mxu1 %v668_v43 }
 0x362   :  { %2037 = vmatpush1.bf16.msra.mxu0 %v2630_v8  ;;  %2069 = vmatpush1.bf16.msra.mxu1 %v2643_v25 }
 0x363   :  { %2039 = vmatprep.subr.bf16.mxu0 %v2632_v9  ;;  %2071 = vmatprep.subr.bf16.mxu1 %v2653_v33 }
 0x364   :  { %927 = vmatprep.mubr.f32.mxu0 %v2554_v0  ;;  %998 = vmatprep.mubr.f32.mxu1 %v2554_v0 }
 0x366   :  { %2041 = vmatpush1.bf16.msra.mxu0 %v2636_v14  ;;  %2073 = vmatpush1.bf16.msra.mxu1 %v2655_v37 }
 0x367   :  { %2043 = vmatprep.subr.bf16.mxu0 %v2639_v17  ;;  %2075 = vmatprep.subr.bf16.mxu1 %v2661_v45 }
 0x36a   :  { %2045 = vmatpush1.bf16.msra.mxu0 %v2646_v26  ;;  %2077 = vmatpush1.bf16.msra.mxu1 %v2667_v48 }
 0x36b   :  { %2047 = vmatprep.subr.bf16.mxu0 %v2650_v30  ;;  %2079 = vmatprep.subr.bf16.mxu1 %v2670_v52 }
 0x36e   :  { %2049 = vmatpush1.bf16.msra.mxu0 %v2659_v42  ;;  %2081 = vmatpush1.bf16.msra.mxu1 %v2679_v62 }
 0x36f   :  { %2051 = vmatprep.subr.bf16.mxu0 %v2664_v46  ;;  %2083 = vmatprep.subr.bf16.mxu1 %v2682_v1 }
 0x372   :  { %2053 = vmatpush1.bf16.msra.mxu0 %v2673_v55  ;;  %2085 = vmatpush1.bf16.msra.mxu1 %v2691_v15 }
 0x373   :  { %2055 = vmatprep.subr.bf16.mxu0 %v2676_v58  ;;  %2087 = vmatprep.subr.bf16.mxu1 %v2694_v18 }
 0x376   :  { %2057 = vmatpush1.bf16.msra.mxu0 %v2685_v7  ;;  %2089 = vmatpush1.bf16.msra.mxu1 %v2703_v31 }
 0x377   :  { %2059 = vmatprep.subr.bf16.mxu0 %v2688_v10  ;;  %2091 = vmatprep.subr.bf16.mxu1 %v2706_v32 }
 0x37a   :  { %2061 = vmatpush1.bf16.msra.mxu0 %v2697_v24  ;;  %2093 = vmatpush1.bf16.msra.mxu1 %v2713_v40 }
 0x37b   :  { %2063 = vmatprep.subr.bf16.mxu0 %v2700_v27  ;;  %2095 = vmatprep.subr.bf16.mxu1 %v2716_v41 }
 0x37e   :  { %2065 = vmatpush1.bf16.msra.mxu0 %v2709_v39  ;;  %2097 = vmatpush1.bf16.msra.mxu1 %v2720_v47 }
 0x37f   :  { %2099 = vmatprep.subr.bf16.mxu0 %v2628_v4  ;;  %2131 = vmatprep.subr.bf16.mxu1 %v2641_v22 }
 0x434   :  { %v747_v44 = vpop.f32.mrb[6].mxu0  ;;  %v818_v49 = vpop.f32.mrb[6].mxu1 }
 0x435   :  { %v823_v50 = vadd.f32 %v747_v44, %v677_v34  ;;  %v749_v51 = vpop.f32.mrb[7].mxu0  ;;  %v820_v53 = vpop.f32.mrb[7].mxu1  ;;  %v825_v2 = vadd.f32 %v818_v49, %v679_v61  ;;  %v860_v34 = vld [vmem:[#allocation4 + $0x88] sm:$0xff] }
 0x436   :  { %v824_v54 = vadd.f32 %v749_v51, %v678_v35  ;;  %v826_v60 = vadd.f32 %v820_v53, %v680_v59 }
 0x437   :  { %v1710_v56 = vmul.f32 -1.442695, %v823_v50 }
 0x438   :  { %v1711_v57 = vmul.f32 -1.442695, %v824_v54  ;;  %v1712_v63 = vmul.f32 -1.442695, %v826_v60  ;;  %v861_v60 = vld [vmem:[#allocation4 + $0x90] sm:$0xff] }
 0x439   :  { %2373 = vpow2.f32 %v1710_v56 }
 0x43a   :  { %2375 = vpow2.f32 %v1711_v57  ;;  %v862_v57 = vld [vmem:[#allocation4 + $0x98] sm:$0xff] }
 0x43b   :  { %2377 = vpow2.f32 %v1712_v63 }
 0x43c   :  { %2379 = vtanh.f32 %v825_v2 }
 0x443   :  { %v2374_v3 = vpop.eup %2373 }
 0x444   :  { %v2376_v5 = vpop.eup %2375  ;;  %v830_v6 = vadd.f32 1.0, %v2374_v3 }
 0x445   :  { %v836_v11 = vadd.f32 1.0, %v2376_v5  ;;  %v2378_v12 = vpop.eup %2377 }
 0x446   :  { %2381 = vrcp.f32 %v830_v6  ;;  %v2380_v13 = vpop.eup %2379  ;;  %v843_v21 = vadd.f32 1.0, %v2378_v12 }
 0x447   :  { %2383 = vrcp.f32 %v836_v11 }
 0x448   :  { %2385 = vrcp.f32 %v843_v21 }
 0x450   :  { %v2382_v16 = vpop.eup %2381 }
 0x451   :  { %v2384_v19 = vpop.eup %2383  ;;  %v847_v20 = vmul.f32 %v2382_v16, %v2380_v13 }
 0x452   :  { %v846_v23 = vmul.f32 %v2384_v19, %v2838_v29  ;;  %v2386_v36 = vpop.eup %2385  ;;  %v859_v29 = vld [vmem:[#allocation4 + $0x80] sm:$0xff] }
 0x454   :  { %v2876_v28 = vadd.f32 %v847_v20, %v846_v23 }
 0x456   :  { %2387 = vtanh.f32 %v2876_v28 }
 0x460   :  { %v2388_v38 = vpop.eup %2387 }
 0x461   :  { %v850_v43 = vmul.f32 %v2388_v38, %v2386_v36 }
 0x463   :  { %928 = vmatmul.mubr.f32.vlgmr.msra.gmra.mrb[8].mxu0 %v850_v43  ;;  %999 = vmatmul.mubr.f32.vlgmr.msra.gmra.mrb[8].mxu1 %v850_v43 }
 0x464   :  { %2101 = vmatpush1.bf16.msra.mxu0 %v2630_v8  ;;  %2133 = vmatpush1.bf16.msra.mxu1 %v2643_v25 }
 0x465   :  { %2103 = vmatprep.subr.bf16.mxu0 %v2632_v9  ;;  %2135 = vmatprep.subr.bf16.mxu1 %v2653_v33 }
 0x466   :  { %1109 = vmatprep.mubr.f32.mxu0 %v2554_v0  ;;  %1180 = vmatprep.mubr.f32.mxu1 %v2554_v0 }
 0x468   :  { %2105 = vmatpush1.bf16.msra.mxu0 %v2636_v14  ;;  %2137 = vmatpush1.bf16.msra.mxu1 %v2655_v37 }
 0x469   :  { %2107 = vmatprep.subr.bf16.mxu0 %v2639_v17  ;;  %2139 = vmatprep.subr.bf16.mxu1 %v2661_v45 }
 0x46c   :  { %2109 = vmatpush1.bf16.msra.mxu0 %v2646_v26  ;;  %2141 = vmatpush1.bf16.msra.mxu1 %v2667_v48 }
 0x46d   :  { %2111 = vmatprep.subr.bf16.mxu0 %v2650_v30  ;;  %2143 = vmatprep.subr.bf16.mxu1 %v2670_v52 }
 0x470   :  { %2113 = vmatpush1.bf16.msra.mxu0 %v2659_v42  ;;  %2145 = vmatpush1.bf16.msra.mxu1 %v2679_v62 }
 0x471   :  { %2115 = vmatprep.subr.bf16.mxu0 %v2664_v46  ;;  %2147 = vmatprep.subr.bf16.mxu1 %v2682_v1 }
 0x474   :  { %2117 = vmatpush1.bf16.msra.mxu0 %v2673_v55  ;;  %2149 = vmatpush1.bf16.msra.mxu1 %v2691_v15 }
 0x475   :  { %2119 = vmatprep.subr.bf16.mxu0 %v2676_v58  ;;  %2151 = vmatprep.subr.bf16.mxu1 %v2694_v18 }
 0x478   :  { %2121 = vmatpush1.bf16.msra.mxu0 %v2685_v7  ;;  %2153 = vmatpush1.bf16.msra.mxu1 %v2703_v31 }
 0x479   :  { %2123 = vmatprep.subr.bf16.mxu0 %v2688_v10  ;;  %2155 = vmatprep.subr.bf16.mxu1 %v2706_v32 }
 0x47c   :  { %2125 = vmatpush1.bf16.msra.mxu0 %v2697_v24  ;;  %2157 = vmatpush1.bf16.msra.mxu1 %v2713_v40 }
 0x47d   :  { %2127 = vmatprep.subr.bf16.mxu0 %v2700_v27  ;;  %2159 = vmatprep.subr.bf16.mxu1 %v2716_v41 }
 0x480   :  { %2129 = vmatpush1.bf16.msra.mxu0 %v2709_v39  ;;  %2161 = vmatpush1.bf16.msra.mxu1 %v2720_v47 }
 0x481   :  { %2163 = vmatprep.subr.bf16.mxu0 %v2628_v4  ;;  %2195 = vmatprep.subr.bf16.mxu1 %v2641_v22 }
 0x536   :  { %v929_v35 = vpop.f32.mrb[8].mxu0  ;;  %v1000_v44 = vpop.f32.mrb[8].mxu1 }
 0x537   :  { %v1005_v49 = vadd.f32 %v929_v35, %v859_v29  ;;  %v931_v50 = vpop.f32.mrb[9].mxu0  ;;  %v1002_v51 = vpop.f32.mrb[9].mxu1  ;;  %v1007_v63 = vadd.f32 %v1000_v44, %v861_v60  ;;  %v1042_v29 = vld [vmem:[#allocation4 + $0xa8] sm:$0xff] }
 0x538   :  { %v1006_v53 = vadd.f32 %v931_v50, %v860_v34  ;;  %v1008_v59 = vadd.f32 %v1002_v51, %v862_v57 }
 0x539   :  { %v1713_v54 = vmul.f32 -1.442695, %v1005_v49 }
 0x53a   :  { %v1714_v56 = vmul.f32 -1.442695, %v1006_v53  ;;  %v1715_v61 = vmul.f32 -1.442695, %v1008_v59  ;;  %v1043_v59 = vld [vmem:[#allocation4 + $0xb0] sm:$0xff] }
 0x53b   :  { %2389 = vpow2.f32 %v1713_v54 }
 0x53c   :  { %2391 = vpow2.f32 %v1714_v56  ;;  %v1044_v56 = vld [vmem:[#allocation4 + $0xb8] sm:$0xff] }
 0x53d   :  { %2393 = vpow2.f32 %v1715_v61 }
 0x53e   :  { %2395 = vtanh.f32 %v1007_v63 }
 0x545   :  { %v2390_v2 = vpop.eup %2389 }
 0x546   :  { %v2392_v3 = vpop.eup %2391  ;;  %v1012_v5 = vadd.f32 1.0, %v2390_v2 }
 0x547   :  { %v1018_v6 = vadd.f32 1.0, %v2392_v3  ;;  %v2394_v11 = vpop.eup %2393 }
 0x548   :  { %2397 = vrcp.f32 %v1012_v5  ;;  %v2396_v12 = vpop.eup %2395  ;;  %v1025_v20 = vadd.f32 1.0, %v2394_v11 }
 0x549   :  { %2399 = vrcp.f32 %v1018_v6 }
 0x54a   :  { %2401 = vrcp.f32 %v1025_v20 }
 0x552   :  { %v2398_v13 = vpop.eup %2397 }
 0x553   :  { %v2400_v16 = vpop.eup %2399  ;;  %v1029_v19 = vmul.f32 %v2398_v13, %v2396_v12 }
 0x554   :  { %v1028_v21 = vmul.f32 %v2400_v16, %v2876_v28  ;;  %v2402_v36 = vpop.eup %2401  ;;  %v1041_v28 = vld [vmem:[#allocation4 + $0xa0] sm:$0xff] }
 0x556   :  { %v2914_v23 = vadd.f32 %v1029_v19, %v1028_v21 }
 0x558   :  { %2403 = vtanh.f32 %v2914_v23 }
 0x562   :  { %v2404_v38 = vpop.eup %2403 }
 0x563   :  { %v1032_v43 = vmul.f32 %v2404_v38, %v2402_v36  ;;  %v1592_v38 = vld [vmem:[#allocation9 + $0x8] sm:$0xff] }
 0x565   :  { %1110 = vmatmul.mubr.f32.vlgmr.msra.gmra.mrb[10].mxu0 %v1032_v43  ;;  %1181 = vmatmul.mubr.f32.vlgmr.msra.gmra.mrb[10].mxu1 %v1032_v43 }
 0x566   :  { %2165 = vmatpush1.bf16.msra.mxu0 %v2630_v8  ;;  %2197 = vmatpush1.bf16.msra.mxu1 %v2643_v25 }
 0x567   :  { %2167 = vmatprep.subr.bf16.mxu0 %v2632_v9  ;;  %2199 = vmatprep.subr.bf16.mxu1 %v2653_v33 }
 0x568   :  { %1291 = vmatprep.mubr.f32.mxu0 %v2554_v0  ;;  %1362 = vmatprep.mubr.f32.mxu1 %v2554_v0 }
 0x56a   :  { %2169 = vmatpush1.bf16.msra.mxu0 %v2636_v14  ;;  %2201 = vmatpush1.bf16.msra.mxu1 %v2655_v37 }
 0x56b   :  { %2171 = vmatprep.subr.bf16.mxu0 %v2639_v17  ;;  %2203 = vmatprep.subr.bf16.mxu1 %v2661_v45 }
 0x56e   :  { %2173 = vmatpush1.bf16.msra.mxu0 %v2646_v26  ;;  %2205 = vmatpush1.bf16.msra.mxu1 %v2667_v48 }
 0x56f   :  { %2175 = vmatprep.subr.bf16.mxu0 %v2650_v30  ;;  %2207 = vmatprep.subr.bf16.mxu1 %v2670_v52 }
 0x572   :  { %2177 = vmatpush1.bf16.msra.mxu0 %v2659_v42  ;;  %2209 = vmatpush1.bf16.msra.mxu1 %v2679_v62 }
 0x573   :  { %2179 = vmatprep.subr.bf16.mxu0 %v2664_v46  ;;  %2211 = vmatprep.subr.bf16.mxu1 %v2682_v1 }
 0x576   :  { %2181 = vmatpush1.bf16.msra.mxu0 %v2673_v55  ;;  %2213 = vmatpush1.bf16.msra.mxu1 %v2691_v15 }
 0x577   :  { %2183 = vmatprep.subr.bf16.mxu0 %v2676_v58  ;;  %2215 = vmatprep.subr.bf16.mxu1 %v2694_v18 }
 0x57a   :  { %2185 = vmatpush1.bf16.msra.mxu0 %v2685_v7  ;;  %2217 = vmatpush1.bf16.msra.mxu1 %v2703_v31 }
 0x57b   :  { %2187 = vmatprep.subr.bf16.mxu0 %v2688_v10  ;;  %2219 = vmatprep.subr.bf16.mxu1 %v2706_v32 }
 0x57e   :  { %2189 = vmatpush1.bf16.msra.mxu0 %v2697_v24  ;;  %2221 = vmatpush1.bf16.msra.mxu1 %v2713_v40 }
 0x57f   :  { %2191 = vmatprep.subr.bf16.mxu0 %v2700_v27  ;;  %2223 = vmatprep.subr.bf16.mxu1 %v2716_v41 }
 0x582   :  { %2193 = vmatpush1.bf16.msra.mxu0 %v2709_v39  ;;  %2225 = vmatpush1.bf16.msra.mxu1 %v2720_v47 }
 0x583   :  { %2227 = vmatprep.subr.bf16.mxu0 %v2628_v4  ;;  %2259 = vmatprep.subr.bf16.mxu1 %v2641_v22 }
 0x638   :  { %v1111_v34 = vpop.f32.mrb[10].mxu0  ;;  %v1182_v35 = vpop.f32.mrb[10].mxu1 }
 0x639   :  { %v1187_v44 = vadd.f32 %v1111_v34, %v1041_v28  ;;  %v1113_v49 = vpop.f32.mrb[11].mxu0  ;;  %v1184_v50 = vpop.f32.mrb[11].mxu1  ;;  %v1189_v61 = vadd.f32 %v1182_v35, %v1043_v59  ;;  %v2555_v28 = vmov 0.0|0.0   ;;  %v1594_v34 = vld [vmem:[#allocation9 + $0x18] sm:$0xff] }
 0x63a   :  { %v1188_v51 = vadd.f32 %v1113_v49, %v1042_v29  ;;  %v1190_v57 = vadd.f32 %v1184_v50, %v1044_v56  ;;  %v1593_v29 = vld [vmem:[#allocation9 + $0x10] sm:$0xff]  ;;  %v1596_v49 = vld [vmem:[#allocation9 + $0x28] sm:$0xff]  ;;  %v1599_v56 = vld [vmem:[#allocation9 + $0x40] sm:$0xff] }
 0x63b   :  { %v1716_v53 = vmul.f32 -1.442695, %v1187_v44  ;;  %v2294_v35 = vpack.c.bf16 %v1594_v34, %v1593_v29  ;;  %v1595_v44 = vld [vmem:[#allocation9 + $0x20] sm:$0xff] }
 0x63c   :  { %v1717_v54 = vmul.f32 -1.442695, %v1188_v51  ;;  %v1718_v60 = vmul.f32 -1.442695, %v1190_v57  ;;  %v2297_v50 = vpack.c.bf16 %v1596_v49, %v1595_v44  ;;  %v1597_v51 = vld [vmem:[#allocation9 + $0x30] sm:$0xff]  ;;  %v1600_v57 = vld [vmem:[#allocation9 + $0x48] sm:$0xff] }
 0x63d   :  { %2405 = vpow2.f32 %v1716_v53  ;;  %v1598_v53 = vld [vmem:[#allocation9 + $0x38] sm:$0xff]  ;;  %v2303_v59 = vpack.c.bf16 %v1600_v57, %v1599_v56 }
 0x63e   :  { %2407 = vpow2.f32 %v1717_v54  ;;  %v2300_v54 = vpack.c.bf16 %v1598_v53, %v1597_v51 }
 0x63f   :  { %2409 = vpow2.f32 %v1718_v60  ;;  %v1601_v60 = vld [vmem:[#allocation9 + $0x50] sm:$0xff] }
 0x640   :  { %2411 = vtanh.f32 %v1189_v61  ;;  %v1602_v61 = vld [vmem:[#allocation9 + $0x58] sm:$0xff] }
 0x647   :  { %v2406_v4 = vpop.eup %2405 }
 0x648   :  { %v2408_v63 = vpop.eup %2407  ;;  %v1194_v22 = vadd.f32 1.0, %v2406_v4  ;;  %v1603_v4 = vld [vmem:[#allocation9 + $0x60] sm:$0xff] }
 0x649   :  { %v1200_v2 = vadd.f32 1.0, %v2408_v63  ;;  %v2410_v3 = vpop.eup %2409  ;;  %v2306_v63 = vpack.c.bf16 %v1602_v61, %v1601_v60 }
 0x64a   :  { %2413 = vrcp.f32 %v1194_v22  ;;  %v2412_v5 = vpop.eup %2411  ;;  %v1207_v13 = vadd.f32 1.0, %v2410_v3  ;;  %v1604_v22 = vld [vmem:[#allocation9 + $0x68] sm:$0xff]  ;;  %v1605_v3 = vld [vmem:[#allocation9 + $0x70] sm:$0xff] }
 0x64b   :  { %2415 = vrcp.f32 %v1200_v2  ;;  %v2309_v2 = vpack.c.bf16 %v1604_v22, %v1603_v4 }
 0x64c   :  { %2417 = vrcp.f32 %v1207_v13 }
 0x654   :  { %v2414_v6 = vpop.eup %2413 }
 0x655   :  { %v2416_v11 = vpop.eup %2415  ;;  %v1211_v12 = vmul.f32 %v2414_v6, %v2412_v5  ;;  %v1606_v5 = vld [vmem:[#allocation9 + $0x78] sm:$0xff] }
 0x656   :  { %v1210_v16 = vmul.f32 %v2416_v11, %v2914_v23  ;;  %v2418_v20 = vpop.eup %2417  ;;  %v1591_v23 = vld [vmem:[#allocation9] sm:$0xff]  ;;  %v2312_v6 = vpack.c.bf16 %v1606_v5, %v1605_v3 }
 0x657   :  { %v2291_v43 = vpack.c.bf16 %v1592_v38, %v1591_v23  ;;  %v1405_v11 = vld [vmem:[#allocation4 + $0xe0] sm:$0xff] }
 0x658   :  { %v2952_v19 = vadd.f32 %v1211_v12, %v1210_v16  ;;  %v1406_v12 = vld [vmem:[#allocation4 + $0xe8] sm:$0xff] }
 0x65a   :  { %2419 = vtanh.f32 %v2952_v19 }
 0x664   :  { %v2420_v21 = vpop.eup %2419 }
 0x665   :  { %v1214_v36 = vmul.f32 %v2420_v21, %v2418_v20 }
 0x667   :  { %1292 = vmatmul.mubr.f32.vlgmr.msra.gmra.mrb[12].mxu0 %v1214_v36  ;;  %1363 = vmatmul.mubr.f32.vlgmr.msra.gmra.mrb[12].mxu1 %v1214_v36 }
 0x668   :  { %2229 = vmatpush1.bf16.msra.mxu0 %v2630_v8  ;;  %2261 = vmatpush1.bf16.msra.mxu1 %v2643_v25  ;;  %v1223_v8 = vld [vmem:[#allocation4 + $0xc0] sm:$0xff] }
 0x669   :  { %2231 = vmatprep.subr.bf16.mxu0 %v2632_v9  ;;  %2263 = vmatprep.subr.bf16.mxu1 %v2653_v33  ;;  %v1224_v9 = vld [vmem:[#allocation4 + $0xc8] sm:$0xff] }
 0x66a   :  { %1473 = vmatprep.mubr.f32.mxu0 %v2554_v0  ;;  %1544 = vmatprep.mubr.f32.mxu1 %v2554_v0 }
 0x66c   :  { %2233 = vmatpush1.bf16.msra.mxu0 %v2636_v14  ;;  %2265 = vmatpush1.bf16.msra.mxu1 %v2655_v37 }
 0x66d   :  { %2235 = vmatprep.subr.bf16.mxu0 %v2639_v17  ;;  %2267 = vmatprep.subr.bf16.mxu1 %v2661_v45  ;;  %v1226_v45 = vld [vmem:[#allocation4 + $0xd8] sm:$0xff] }
 0x670   :  { %2237 = vmatpush1.bf16.msra.mxu0 %v2646_v26  ;;  %2269 = vmatpush1.bf16.msra.mxu1 %v2667_v48  ;;  %v1225_v48 = vld [vmem:[#allocation4 + $0xd0] sm:$0xff] }
 0x671   :  { %2239 = vmatprep.subr.bf16.mxu0 %v2650_v30  ;;  %2271 = vmatprep.subr.bf16.mxu1 %v2670_v52 }
 0x674   :  { %2241 = vmatpush1.bf16.msra.mxu0 %v2659_v42  ;;  %2273 = vmatpush1.bf16.msra.mxu1 %v2679_v62 }
 0x675   :  { %2243 = vmatprep.subr.bf16.mxu0 %v2664_v46  ;;  %2275 = vmatprep.subr.bf16.mxu1 %v2682_v1 }
 0x678   :  { %2245 = vmatpush1.bf16.msra.mxu0 %v2673_v55  ;;  %2277 = vmatpush1.bf16.msra.mxu1 %v2691_v15 }
 0x679   :  { %2247 = vmatprep.subr.bf16.mxu0 %v2676_v58  ;;  %2279 = vmatprep.subr.bf16.mxu1 %v2694_v18 }
 0x67c   :  { %2249 = vmatpush1.bf16.msra.mxu0 %v2685_v7  ;;  %2281 = vmatpush1.bf16.msra.mxu1 %v2703_v31 }
 0x67d   :  { %2251 = vmatprep.subr.bf16.mxu0 %v2688_v10  ;;  %2283 = vmatprep.subr.bf16.mxu1 %v2706_v32 }
 0x680   :  { %2253 = vmatpush1.bf16.msra.mxu0 %v2697_v24  ;;  %2285 = vmatpush1.bf16.msra.mxu1 %v2713_v40 }
 0x681   :  { %2255 = vmatprep.subr.bf16.mxu0 %v2700_v27  ;;  %2287 = vmatprep.subr.bf16.mxu1 %v2716_v41 }
 0x684   :  { %2257 = vmatpush1.bf16.msra.mxu0 %v2709_v39  ;;  %2289 = vmatpush1.bf16.msra.mxu1 %v2720_v47 }
 0x685   :  { %2290 = vmatprep.subr.bf16.mxu0 %v2555_v28 }
 0x73a   :  { %v1293_v14 = vpop.f32.mrb[12].mxu0  ;;  %v1364_v17 = vpop.f32.mrb[12].mxu1 }
 0x73b   :  { %v1369_v25 = vadd.f32 %v1293_v14, %v1223_v8  ;;  %v1295_v26 = vpop.f32.mrb[13].mxu0  ;;  %v1366_v30 = vpop.f32.mrb[13].mxu1  ;;  %v1371_v55 = vadd.f32 %v1364_v17, %v1225_v48  ;;  %v1407_v17 = vld [vmem:[#allocation4 + $0xf0] sm:$0xff] }
 0x73c   :  { %v1370_v33 = vadd.f32 %v1295_v26, %v1224_v9  ;;  %v1372_v46 = vadd.f32 %v1366_v30, %v1226_v45 }
 0x73d   :  { %v1719_v37 = vmul.f32 -1.442695, %v1369_v25 }
 0x73e   :  { %v1720_v42 = vmul.f32 -1.442695, %v1370_v33  ;;  %v1721_v52 = vmul.f32 -1.442695, %v1372_v46 }
 0x73f   :  { %2421 = vpow2.f32 %v1719_v37 }
 0x740   :  { %2423 = vpow2.f32 %v1720_v42 }
 0x741   :  { %2425 = vpow2.f32 %v1721_v52 }
 0x742   :  { %2427 = vtanh.f32 %v1371_v55 }
 0x749   :  { %v2422_v58 = vpop.eup %2421 }
 0x74a   :  { %v2424_v62 = vpop.eup %2423  ;;  %v1376_v1 = vadd.f32 1.0, %v2422_v58 }
 0x74b   :  { %v1382_v7 = vadd.f32 1.0, %v2424_v62  ;;  %v2426_v10 = vpop.eup %2425 }
 0x74c   :  { %2429 = vrcp.f32 %v1376_v1  ;;  %v2428_v15 = vpop.eup %2427  ;;  %v1389_v31 = vadd.f32 1.0, %v2426_v10 }
 0x74d   :  { %2431 = vrcp.f32 %v1382_v7 }
 0x74e   :  { %2433 = vrcp.f32 %v1389_v31 }
 0x756   :  { %v2430_v18 = vpop.eup %2429 }
 0x757   :  { %v2432_v24 = vpop.eup %2431  ;;  %v1393_v27 = vmul.f32 %v2430_v18, %v2428_v15  ;;  %v1725_v18 = vld [vmem:[%s3011_s3] ss:$0 sm:$0xff] }
 0x758   :  { %v1392_v32 = vmul.f32 %v2432_v24, %v2952_v19  ;;  %v2434_v40 = vpop.eup %2433 }
 0x75a   :  { %v2988_v39 = vadd.f32 %v1393_v27, %v1392_v32 }
 0x75c   :  { %2435 = vtanh.f32 %v2988_v39 }
 0x766   :  { %v2436_v41 = vpop.eup %2435 }
 0x767   :  { %v1396_v47 = vmul.f32 %v2436_v41, %v2434_v40 }
 0x769   :  { %1474 = vmatmul.mubr.f32.vlgmr.msra.gmra.mrb[14].mxu0 %v1396_v47  ;;  %1545 = vmatmul.mubr.f32.vlgmr.msra.gmra.mrb[14].mxu1 %v1396_v47 }
 0x76a   :  { %2292 = vmatpush3.bf16.msra.mxu0 %v2291_v43  ;;  %1775 = vmatprep.mubr.msk.f32.mxu0 %vm2556_vm0, %v2554_v0  ;;  %v1408_v0 = vld [vmem:[#allocation4 + $0xf8] sm:$0xff] }
 0x76b   :  { %2293 = vmatprep.subr.bf16.mxu0 %v2555_v28 }
 0x76e   :  { %2295 = vmatpush3.bf16.msra.mxu0 %v2294_v35 }
 0x76f   :  { %2296 = vmatprep.subr.bf16.mxu0 %v2555_v28 }
 0x772   :  { %2298 = vmatpush3.bf16.msra.mxu0 %v2297_v50 }
 0x773   :  { %2299 = vmatprep.subr.bf16.mxu0 %v2555_v28 }
 0x776   :  { %2301 = vmatpush3.bf16.msra.mxu0 %v2300_v54 }
 0x777   :  { %2302 = vmatprep.subr.bf16.mxu0 %v2555_v28 }
 0x77a   :  { %2304 = vmatpush3.bf16.msra.mxu0 %v2303_v59 }
 0x77b   :  { %2305 = vmatprep.subr.bf16.mxu0 %v2555_v28 }
 0x77e   :  { %2307 = vmatpush3.bf16.msra.mxu0 %v2306_v63 }
 0x77f   :  { %2308 = vmatprep.subr.bf16.mxu0 %v2555_v28 }
 0x782   :  { %2310 = vmatpush3.bf16.msra.mxu0 %v2309_v2 }
 0x783   :  { %2311 = vmatprep.subr.bf16.mxu0 %v2555_v28 }
 0x786   :  { %2313 = vmatpush3.bf16.msra.mxu0 %v2312_v6 }
 0x83c   :  { %v1475_v13 = vpop.f32.mrb[14].mxu0  ;;  %v1546_v16 = vpop.f32.mrb[14].mxu1 }
 0x83d   :  { %v1551_v19 = vadd.f32 %v1475_v13, %v1405_v11  ;;  %v1477_v20 = vpop.f32.mrb[15].mxu0  ;;  %v1548_v21 = vpop.f32.mrb[15].mxu1  ;;  %v1553_v26 = vadd.f32 %v1546_v16, %v1407_v17 }
 0x83e   :  { %v1552_v36 = vadd.f32 %v1477_v20, %v1406_v12  ;;  %v1554_v14 = vadd.f32 %v1548_v21, %v1408_v0 }
 0x83f   :  { %v1722_v8 = vmul.f32 -1.442695, %v1551_v19 }
 0x840   :  { %v1723_v9 = vmul.f32 -1.442695, %v1552_v36  ;;  %v1724_v25 = vmul.f32 -1.442695, %v1554_v14 }
 0x841   :  { %2437 = vpow2.f32 %v1722_v8 }
 0x842   :  { %2439 = vpow2.f32 %v1723_v9 }
 0x843   :  { %2441 = vpow2.f32 %v1724_v25 }
 0x844   :  { %2443 = vtanh.f32 %v1553_v26 }
 0x84b   :  { %v2438_v30 = vpop.eup %2437 }
 0x84c   :  { %v2440_v33 = vpop.eup %2439  ;;  %v1558_v37 = vadd.f32 1.0, %v2438_v30 }
 0x84d   :  { %v1564_v42 = vadd.f32 1.0, %v2440_v33  ;;  %v2442_v45 = vpop.eup %2441 }
 0x84e   :  { %2445 = vrcp.f32 %v1558_v37  ;;  %v2444_v46 = vpop.eup %2443  ;;  %v1571_v58 = vadd.f32 1.0, %v2442_v45 }
 0x84f   :  { %2447 = vrcp.f32 %v1564_v42 }
 0x850   :  { %2449 = vrcp.f32 %v1571_v58 }
 0x858   :  { %v2446_v48 = vpop.eup %2445 }
 0x859   :  { %v2448_v52 = vpop.eup %2447  ;;  %v1575_v55 = vmul.f32 %v2446_v48, %v2444_v46 }
 0x85a   :  { %v1574_v62 = vmul.f32 %v2448_v52, %v2988_v39  ;;  %v2450_v7 = vpop.eup %2449 }
 0x85c   :  { %v1576_v1 = vadd.f32 %v1575_v55, %v1574_v62 }
 0x85e   :  { %2451 = vtanh.f32 %v1576_v1 }
 0x868   :  { %v2452_v10 = vpop.eup %2451 }
 0x869   :  { %v1578_v15 = vmul.f32 %v2452_v10, %v2450_v7 }
 0x86b   :  { %1776 = vmatmul.mubr.f32.vlgmr.msra.gmra.mrb[16].mxu0 %v1578_v15 }
 0x93e   :  { %v1680_v24 = vpop.f32.mrb[16].mxu0 }
 0x93f   :  { %v1681_v27 = vadd.f32 %v1725_v18, %v1680_v24  ;;  %v1777_v31 = vpop.f32.mrb[17].mxu0 }
 0x941   :  { %1684 = vst [vmem:[#allocation10] sm:$0xff] %v1681_v27 }
 0x942   :  { %2530 = shalt.err (!%p2527_p0)
}
 0x943   :  { %s2531_s7 = scalar_lea.hbm %s3012_s4, 128 }
 0x944   :  { %p2532_p1 = scmp.ne.s32.totalorder %s3012_s4, %s2531_s7  ;;  %p2535_p2 = scmp.lt.u32.totalorder %s2531_s7, %s3012_s4 }
 0x946   :  { %p2537_p3 = pnand %p2535_p2, %p2532_p1 }
 0x948   :  { %2540 = shalt.err (!%p2537_p3)
}
 0x949   :  { %1694 = dma.vmem_to_hbm [thread:$0]  %s1692_s29, 128, %s3012_s4, [#allocation6]  }
 0x94a   :  { %2545 = dma.done.wait [#allocation6], 128  }
 0x94b   :  { %2546 = vsyncadd [#allocation6], 4294967168 }
 0x94c   :  { %1698 = vsyncpa [#allocation5], 1 }
 0x94d   :  { %1699 = vsyncpa [#allocation8], 1 }
 0x94e   :  { %1700 = vsyncpa [#allocation6], 1 }

</bundles_post_ra>
